<compile_context>
chip_gen: v7x
topology: tpu7x:2x2x1
jax: 0.10.0
libtpu: 0.0.40
codegen_flags: <defaults>
</compile_context>

<pallas_src>
import jax
import jax.numpy as jnp
from jax.experimental import pallas as pl
from jax.experimental.pallas import tpu as pltpu


def gene_pathway_kernel(x_ref,               # (bm, gk)   bf16 input block
                        wf_ref,              # (gk, P)    bf16  cm @ W_dense block
                        bd_ref,              # (1, P)     f32   dense bias
                        wa1_ref, ba1_ref,    # (P, H) bf16, (1, H) f32
                        wa2_ref, ba2_ref,    # (H, P) bf16, (1, P) f32
                        wcc_ref, bcc_ref,    # (P, 128) bf16, (1, 128) f32  conv-folded classifier
                        out_ref,             # (bm, 128)  f32  padded logits
                        attn_ref,            # (bm, P)    f32  attention weights
                        h_acc):              # VMEM (bm, P) f32 accumulator
    k = pl.program_id(1)

    @pl.when(k == 0)
    def _():
        h_acc[...] = jnp.zeros_like(h_acc)

    # h += x_blk @ (cm @ W_dense)_blk      (bf16 operands, f32 accumulation)
    h_acc[...] += jnp.dot(x_ref[...], wf_ref[...],
                          preferred_element_type=jnp.float32)

    @pl.when(k == pl.num_programs(1) - 1)
    def _():
        h = h_acc[...] + bd_ref[...]                         # dense output (f32)

        # attn_weights = softmax(Linear(tanh(Linear(h))), dim=1)
        a = jnp.tanh(jnp.dot(h.astype(jnp.bfloat16), wa1_ref[...],
                             preferred_element_type=jnp.float32) + ba1_ref[...])
        logits = jnp.dot(a.astype(jnp.bfloat16), wa2_ref[...],
                         preferred_element_type=jnp.float32) + ba2_ref[...]
        m = jnp.max(logits, axis=1, keepdims=True)
        e = jnp.exp(logits - m)
        attn = e * pl.reciprocal(jnp.sum(e, axis=1, keepdims=True), approx=True)
        attn_ref[...] = attn

        # classifier(conv(attn * h)): Conv1d is pre-folded into wcc / bcc, so
        # this is a single lane-dense (bm, P) @ (P, 128) matmul.
        w = (attn * h).astype(jnp.bfloat16)
        out_ref[...] = (jnp.dot(w, wcc_ref[...],
                                preferred_element_type=jnp.float32)
                        + bcc_ref[...])


def prepare_params(params, pad_n=128):
    """One-time (per weight set) preparation:
      * fold Conv1d(1,1,3,pad=1) into the classifier weight/bias (exact),
      * fuse cm @ W_dense (both are static at inference),
      * zero-pad classifier to a lane-dense 128-wide output,
      * cast MXU operands to bf16 (biases stay f32)."""
    hp = jax.lax.Precision.HIGHEST
    P = params["cm"].shape[1]
    w0, w1, w2, cb = params["conv"]
    wc = params["wc"]                                        # (P, 2)

    # out[:, j] = sum_p conv_out[:, p] * wc[p, j] + bc[j]
    #           = sum_q (attn*h)[:, q] * wc_conv[q, j] + cb * sum_p wc[p, j] + bc[j]
    wc_conv = w1 * wc
    wc_conv = wc_conv.at[:-1].add(w0 * wc[1:])               # w0 * w[:, q]   -> wc[q+1]
    wc_conv = wc_conv.at[1:].add(w2 * wc[:-1])               # w2 * w[:, q]   -> wc[q-1]
    bc_fused = params["bc"] + cb * jnp.sum(wc, axis=0, keepdims=True)   # (1, 2)

    n_out = wc.shape[1]
    wcc = jnp.zeros((P, pad_n), jnp.float32).at[:, :n_out].set(wc_conv)
    bcc = jnp.zeros((1, pad_n), jnp.float32).at[:, :n_out].set(bc_fused)

    wf = jnp.dot(params["cm"], params["wd"], precision=hp)   # (G, P), f32 fold

    return {
        "wf": wf.astype(jnp.bfloat16),
        "bd": params["bd"],
        "wa1": params["wa1"].astype(jnp.bfloat16),
        "ba1": params["ba1"],
        "wa2": params["wa2"].astype(jnp.bfloat16),
        "ba2": params["ba2"],
        "wcc": wcc.astype(jnp.bfloat16),
        "bcc": bcc,
    }


def gene_pathway_classifier(x, prep, *, num_classes=2, bm=128, gk=512):
    B, G = x.shape
    P = prep["wf"].shape[1]
    H = prep["wa1"].shape[1]
    pad_n = prep["wcc"].shape[1]

    bm = min(bm, B)
    gk = min(gk, G)
    # Zero-pad batch / gene dims up to the tile grid (zeros contribute nothing
    # to the gene reduction; padded batch rows are sliced off at the end).
    Bp = pl.cdiv(B, bm) * bm
    Gp = pl.cdiv(G, gk) * gk
    xb = x.astype(jnp.bfloat16)
    if Bp != B or Gp != G:
        xb = jnp.pad(xb, ((0, Bp - B), (0, Gp - G)))
    wf = prep["wf"]
    if Gp != G:
        wf = jnp.pad(wf, ((0, Gp - G), (0, 0)))

    grid = (Bp // bm, Gp // gk)    # (parallel batch, arbitrary gene-reduction)

    grid_spec = pltpu.PrefetchScalarGridSpec(
        num_scalar_prefetch=0,
        grid=grid,
        in_specs=[
            pl.BlockSpec((bm, gk), lambda i, k: (i, k)),     # x block
            pl.BlockSpec((gk, P), lambda i, k: (k, 0)),      # fused cm @ Wd
            pl.BlockSpec((1, P), lambda i, k: (0, 0)),       # bd
            pl.BlockSpec((P, H), lambda i, k: (0, 0)),       # wa1
            pl.BlockSpec((1, H), lambda i, k: (0, 0)),       # ba1
            pl.BlockSpec((H, P), lambda i, k: (0, 0)),       # wa2
            pl.BlockSpec((1, P), lambda i, k: (0, 0)),       # ba2
            pl.BlockSpec((P, pad_n), lambda i, k: (0, 0)),   # conv-folded wc (padded)
            pl.BlockSpec((1, pad_n), lambda i, k: (0, 0)),   # conv-folded bc (padded)
        ],
        out_specs=[
            pl.BlockSpec((bm, pad_n), lambda i, k: (i, 0)),  # padded logits
            pl.BlockSpec((bm, P), lambda i, k: (i, 0)),      # attention weights
        ],
        scratch_shapes=[pltpu.VMEM((bm, P), jnp.float32)],
    )

    out_pad, attn = pl.pallas_call(
        gene_pathway_kernel,
        out_shape=(jax.ShapeDtypeStruct((Bp, pad_n), jnp.float32),
                   jax.ShapeDtypeStruct((Bp, P), jnp.float32)),
        grid_spec=grid_spec,
        compiler_params=pltpu.CompilerParams(
            dimension_semantics=("parallel", "arbitrary")),
    )(xb, wf, prep["bd"],
      prep["wa1"], prep["ba1"], prep["wa2"], prep["ba2"],
      prep["wcc"], prep["bcc"])

    return out_pad[:B, :num_classes], attn[:B]


def reference(x, params):
    """Pure-JAX f32 reference matching the PyTorch forward exactly."""
    hp = jax.lax.Precision.HIGHEST
    h = jnp.dot(x, params["cm"], precision=hp)
    h = jnp.dot(h, params["wd"], precision=hp) + params["bd"]
    a = jnp.tanh(jnp.dot(h, params["wa1"], precision=hp) + params["ba1"])
    logits = jnp.dot(a, params["wa2"], precision=hp) + params["ba2"]
    attn = jax.nn.softmax(logits, axis=1)
    w = attn * h
    P = w.shape[1]
    cw = params["conv"]
    padded = jnp.pad(w, ((0, 0), (1, 1)))
    conv_out = (cw[0] * padded[:, :P] + cw[1] * padded[:, 1:P + 1]
                + cw[2] * padded[:, 2:] + cw[3])
    out = jnp.dot(conv_out, params["wc"], precision=hp) + params["bc"]
    return out, attn


def init_params(key, gene_num, pathway_num, hidden=128):
    ks = jax.random.split(key, 10)
    u = lambda k, shape, scale: jax.random.uniform(
        k, shape, jnp.float32, minval=-scale, maxval=scale)
    return {
        # connection matrix ~ torch.rand (uniform [0,1)), frozen parameter
        "cm": jax.random.uniform(ks[0], (gene_num, pathway_num), jnp.float32),
        # dense: Linear(P, P)    (stored as (in, out))
        "wd": u(ks[1], (pathway_num, pathway_num), 1.0 / pathway_num ** 0.5),
        "bd": u(ks[2], (1, pathway_num), 1.0 / pathway_num ** 0.5),
        # attention: Linear(P, 128) -> Tanh -> Linear(128, P)
        "wa1": u(ks[3], (pathway_num, hidden), 1.0 / pathway_num ** 0.5),
        "ba1": u(ks[4], (1, hidden), 1.0 / pathway_num ** 0.5),
        "wa2": u(ks[5], (hidden, pathway_num), 1.0 / hidden ** 0.5),
        "ba2": u(ks[6], (1, pathway_num), 1.0 / hidden ** 0.5),
        # conv1d(1, 1, 3, padding=1): [w0, w1, w2, bias]
        "conv": u(ks[7], (4,), 1.0 / 3 ** 0.5),
        # classifier: Linear(P, 2)
        "wc": u(ks[8], (pathway_num, 2), 1.0 / pathway_num ** 0.5),
        "bc": u(ks[9], (1, 2), 1.0 / pathway_num ** 0.5),
    }


if __name__ == "__main__":
    # Small shapes consistent with the module (gene_num / pathway_num are ctor
    # args); chosen so both grid axes have >1 block (batch 128/64, genes 512/256).
    B, GENE, PATH, HID = 128, 512, 256, 128

    key = jax.random.PRNGKey(0)
    k_params, k_x = jax.random.split(key)
    params = init_params(k_params, GENE, PATH, HID)
    x = jax.random.normal(k_x, (B, GENE), jnp.float32)

    prep = prepare_params(params)
    logits, attn = gene_pathway_classifier(x, prep, bm=64, gk=256)
    jax.block_until_ready((logits, attn))

    ref_logits, ref_attn = reference(x, params)
    assert logits.shape == (B, 2) and attn.shape == (B, PATH)
    # Tolerances accommodate bf16 MXU operands (f32 accumulation) and the
    # approx-EUP reciprocal in the softmax; measured errors are ~10x smaller.
    assert jnp.allclose(logits, ref_logits, rtol=2e-2, atol=1e-2), "logits mismatch"
    assert jnp.allclose(attn, ref_attn, rtol=5e-2, atol=1e-3), "attn mismatch"

    print("KERNEL_OK")
</pallas_src>

<mosaic_0001>
module attributes {stable_mosaic.version = 11 : i64} {
  func.func @gene_pathway_kernel(%arg0: i32, %arg1: i32, %arg2: memref<64x256xbf16, #tpu.memory_space<vmem>>, %arg3: memref<256x256xbf16, #tpu.memory_space<vmem>>, %arg4: memref<1x256xf32, #tpu.memory_space<vmem>>, %arg5: memref<256x128xbf16, #tpu.memory_space<vmem>>, %arg6: memref<1x128xf32, #tpu.memory_space<vmem>>, %arg7: memref<128x256xbf16, #tpu.memory_space<vmem>>, %arg8: memref<1x256xf32, #tpu.memory_space<vmem>>, %arg9: memref<256x128xbf16, #tpu.memory_space<vmem>>, %arg10: memref<1x128xf32, #tpu.memory_space<vmem>>, %arg11: memref<64x128xf32, #tpu.memory_space<vmem>>, %arg12: memref<64x256xf32, #tpu.memory_space<vmem>>, %arg13: memref<64x256xf32, #tpu.memory_space<vmem>>) attributes {dimension_semantics = [#tpu.dimension_semantics<parallel>, #tpu.dimension_semantics<arbitrary>], iteration_bounds = array<i64: 2, 2>, scalar_prefetch = 0 : i64, scratch_operands = 1 : i64, tpu.core_type = #tpu.core_type<tc>, window_params = [{transform_indices = @transform_0, window_bounds = array<i64: 64, 256>}, {transform_indices = @transform_1, window_bounds = array<i64: 256, 256>}, {pipeline_mode = #tpu.pipeline_mode<synchronous>, transform_indices = @transform_2, window_bounds = array<i64: 1, 256>}, {pipeline_mode = #tpu.pipeline_mode<synchronous>, transform_indices = @transform_3, window_bounds = array<i64: 256, 128>}, {pipeline_mode = #tpu.pipeline_mode<synchronous>, transform_indices = @transform_4, window_bounds = array<i64: 1, 128>}, {pipeline_mode = #tpu.pipeline_mode<synchronous>, transform_indices = @transform_5, window_bounds = array<i64: 128, 256>}, {pipeline_mode = #tpu.pipeline_mode<synchronous>, transform_indices = @transform_6, window_bounds = array<i64: 1, 256>}, {pipeline_mode = #tpu.pipeline_mode<synchronous>, transform_indices = @transform_7, window_bounds = array<i64: 256, 128>}, {pipeline_mode = #tpu.pipeline_mode<synchronous>, transform_indices = @transform_8, window_bounds = array<i64: 1, 128>}, {transform_indices = @transform_9, window_bounds = array<i64: 64, 128>}, {transform_indices = @transform_10, window_bounds = array<i64: 64, 256>}]} {
    %c0_i32 = arith.constant 0 : i32
    %0 = arith.cmpi eq, %arg1, %c0_i32 : i32
    %1 = arith.extui %0 : i1 to i32
    %c0_i32_0 = arith.constant 0 : i32
    %2 = arith.cmpi ne, %1, %c0_i32_0 : i32
    scf.if %2 {
      %cst_9 = arith.constant 0.000000e+00 : f32
      %12 = vector.broadcast %cst_9 : f32 to vector<64x256xf32>
      %c0_10 = arith.constant 0 : index
      %c0_11 = arith.constant 0 : index
      %13 = vector.load %arg13[%c0_10, %c0_11] : memref<64x256xf32, #tpu.memory_space<vmem>>, vector<64x256xf32>
      tpu.vector_store %arg13[%c0_10, %c0_11], %12 {strides = array<i32>} : memref<64x256xf32, #tpu.memory_space<vmem>>, vector<64x256xf32>,
    } else {
    }
    %c0 = arith.constant 0 : index
    %c0_1 = arith.constant 0 : index
    %3 = vector.load %arg13[%c0, %c0_1] : memref<64x256xf32, #tpu.memory_space<vmem>>, vector<64x256xf32>
    %c0_2 = arith.constant 0 : index
    %c0_3 = arith.constant 0 : index
    %4 = vector.load %arg2[%c0_2, %c0_3] : memref<64x256xbf16, #tpu.memory_space<vmem>>, vector<64x256xbf16>
    %c0_4 = arith.constant 0 : index
    %c0_5 = arith.constant 0 : index
    %5 = vector.load %arg3[%c0_4, %c0_5] : memref<256x256xbf16, #tpu.memory_space<vmem>>, vector<256x256xbf16>
    %cst = arith.constant dense<0.000000e+00> : vector<64x256xf32>
    %6 = tpu.matmul %4, %5, %cst {dimension_numbers = #tpu.dot_dimension_numbers<[1], [0], [0], [1], [0, 0, 1, 1], [], []>} : vector<64x256xbf16>, vector<256x256xbf16>, vector<64x256xf32> -> vector<64x256xf32>
    %7 = arith.addf %3, %6 : vector<64x256xf32>
    %c0_6 = arith.constant 0 : index
    %c0_7 = arith.constant 0 : index
    %8 = vector.load %arg13[%c0_6, %c0_7] : memref<64x256xf32, #tpu.memory_space<vmem>>, vector<64x256xf32>
    tpu.vector_store %arg13[%c0_6, %c0_7], %7 {strides = array<i32>} : memref<64x256xf32, #tpu.memory_space<vmem>>, vector<64x256xf32>,
    %c1_i32 = arith.constant 1 : i32
    %9 = arith.cmpi eq, %arg1, %c1_i32 : i32
    %10 = arith.extui %9 : i1 to i32
    %c0_i32_8 = arith.constant 0 : i32
    %11 = arith.cmpi ne, %10, %c0_i32_8 : i32
    scf.if %11 {
      %c0_9 = arith.constant 0 : index
      %c0_10 = arith.constant 0 : index
      %12 = vector.load %arg13[%c0_9, %c0_10] : memref<64x256xf32, #tpu.memory_space<vmem>>, vector<64x256xf32>
      %c0_11 = arith.constant 0 : index
      %c0_12 = arith.constant 0 : index
      %13 = vector.load %arg4[%c0_11, %c0_12] : memref<1x256xf32, #tpu.memory_space<vmem>>, vector<1x256xf32>
      %14 = vector.broadcast %13 : vector<1x256xf32> to vector<64x256xf32>
      %15 = arith.addf %12, %14 : vector<64x256xf32>
      %16 = arith.truncf %15 : vector<64x256xf32> to vector<64x256xbf16>
      %c0_13 = arith.constant 0 : index
      %c0_14 = arith.constant 0 : index
      %17 = vector.load %arg5[%c0_13, %c0_14] : memref<256x128xbf16, #tpu.memory_space<vmem>>, vector<256x128xbf16>
      %cst_15 = arith.constant dense<0.000000e+00> : vector<64x128xf32>
      %18 = tpu.matmul %16, %17, %cst_15 {dimension_numbers = #tpu.dot_dimension_numbers<[1], [0], [0], [1], [0, 0, 1, 1], [], []>} : vector<64x256xbf16>, vector<256x128xbf16>, vector<64x128xf32> -> vector<64x128xf32>
      %c0_16 = arith.constant 0 : index
      %c0_17 = arith.constant 0 : index
      %19 = vector.load %arg6[%c0_16, %c0_17] : memref<1x128xf32, #tpu.memory_space<vmem>>, vector<1x128xf32>
      %20 = vector.broadcast %19 : vector<1x128xf32> to vector<64x128xf32>
      %21 = arith.addf %18, %20 : vector<64x128xf32>
      %22 = math.tanh %21 : vector<64x128xf32>
      %23 = arith.truncf %22 : vector<64x128xf32> to vector<64x128xbf16>
      %c0_18 = arith.constant 0 : index
      %c0_19 = arith.constant 0 : index
      %24 = vector.load %arg7[%c0_18, %c0_19] : memref<128x256xbf16, #tpu.memory_space<vmem>>, vector<128x256xbf16>
      %cst_20 = arith.constant dense<0.000000e+00> : vector<64x256xf32>
      %25 = tpu.matmul %23, %24, %cst_20 {dimension_numbers = #tpu.dot_dimension_numbers<[1], [0], [0], [1], [0, 0, 1, 1], [], []>} : vector<64x128xbf16>, vector<128x256xbf16>, vector<64x256xf32> -> vector<64x256xf32>
      %c0_21 = arith.constant 0 : index
      %c0_22 = arith.constant 0 : index
      %26 = vector.load %arg8[%c0_21, %c0_22] : memref<1x256xf32, #tpu.memory_space<vmem>>, vector<1x256xf32>
      %27 = vector.broadcast %26 : vector<1x256xf32> to vector<64x256xf32>
      %28 = arith.addf %25, %27 : vector<64x256xf32>
      %cst_23 = arith.constant dense<0xFF800000> : vector<64xf32>
      %29 = vector.multi_reduction <maximumf>, %28, %cst_23 [1] : vector<64x256xf32> to vector<64xf32>
      %30 = vector.shape_cast %29 : vector<64xf32> to vector<64x1xf32>
      %31 = vector.broadcast %30 : vector<64x1xf32> to vector<64x256xf32>
      %32 = arith.subf %28, %31 : vector<64x256xf32>
      %33 = math.exp %32 : vector<64x256xf32>
      %cst_24 = arith.constant dense<0.000000e+00> : vector<64xf32>
      %34 = vector.multi_reduction <add>, %33, %cst_24 [1] : vector<64x256xf32> to vector<64xf32>
      %35 = vector.shape_cast %34 : vector<64xf32> to vector<64x1xf32>
      %36 = tpu.reciprocal %35 {approx = true} : vector<64x1xf32> -> vector<64x1xf32>
      %37 = vector.broadcast %36 : vector<64x1xf32> to vector<64x256xf32>
      %38 = arith.mulf %33, %37 : vector<64x256xf32>
      %c0_25 = arith.constant 0 : index
      %c0_26 = arith.constant 0 : index
      %39 = vector.load %arg12[%c0_25, %c0_26] : memref<64x256xf32, #tpu.memory_space<vmem>>, vector<64x256xf32>
      tpu.vector_store %arg12[%c0_25, %c0_26], %38 {strides = array<i32>} : memref<64x256xf32, #tpu.memory_space<vmem>>, vector<64x256xf32>,
      %40 = arith.mulf %38, %15 : vector<64x256xf32>
      %41 = arith.truncf %40 : vector<64x256xf32> to vector<64x256xbf16>
      %c0_27 = arith.constant 0 : index
      %c0_28 = arith.constant 0 : index
      %42 = vector.load %arg9[%c0_27, %c0_28] : memref<256x128xbf16, #tpu.memory_space<vmem>>, vector<256x128xbf16>
      %cst_29 = arith.constant dense<0.000000e+00> : vector<64x128xf32>
      %43 = tpu.matmul %41, %42, %cst_29 {dimension_numbers = #tpu.dot_dimension_numbers<[1], [0], [0], [1], [0, 0, 1, 1], [], []>} : vector<64x256xbf16>, vector<256x128xbf16>, vector<64x128xf32> -> vector<64x128xf32>
      %c0_30 = arith.constant 0 : index
      %c0_31 = arith.constant 0 : index
      %44 = vector.load %arg10[%c0_30, %c0_31] : memref<1x128xf32, #tpu.memory_space<vmem>>, vector<1x128xf32>
      %45 = vector.broadcast %44 : vector<1x128xf32> to vector<64x128xf32>
      %46 = arith.addf %43, %45 : vector<64x128xf32>
      %c0_32 = arith.constant 0 : index
      %c0_33 = arith.constant 0 : index
      %47 = vector.load %arg11[%c0_32, %c0_33] : memref<64x128xf32, #tpu.memory_space<vmem>>, vector<64x128xf32>
      tpu.vector_store %arg11[%c0_32, %c0_33], %46 {strides = array<i32>} : memref<64x128xf32, #tpu.memory_space<vmem>>, vector<64x128xf32>,
    } else {
    }
    return
  }
  func.func @transform_0(%arg0: i32, %arg1: i32) -> (i32, i32) {
    %c0_i32 = arith.constant 0 : i32
    return %arg0, %arg1 : i32, i32
  }
  func.func @transform_1(%arg0: i32, %arg1: i32) -> (i32, i32) {
    %c0_i32 = arith.constant 0 : i32
    %c0_i32_0 = arith.constant 0 : i32
    return %arg1, %c0_i32 : i32, i32
  }
  func.func @transform_2(%arg0: i32, %arg1: i32) -> (i32, i32) {
    %c0_i32 = arith.constant 0 : i32
    %c0_i32_0 = arith.constant 0 : i32
    %c0_i32_1 = arith.constant 0 : i32
    return %c0_i32, %c0_i32_0 : i32, i32
  }
  func.func @transform_3(%arg0: i32, %arg1: i32) -> (i32, i32) {
    %c0_i32 = arith.constant 0 : i32
    %c0_i32_0 = arith.constant 0 : i32
    %c0_i32_1 = arith.constant 0 : i32
    return %c0_i32, %c0_i32_0 : i32, i32
  }
  func.func @transform_4(%arg0: i32, %arg1: i32) -> (i32, i32) {
    %c0_i32 = arith.constant 0 : i32
    %c0_i32_0 = arith.constant 0 : i32
    %c0_i32_1 = arith.constant 0 : i32
    return %c0_i32, %c0_i32_0 : i32, i32
  }
  func.func @transform_5(%arg0: i32, %arg1: i32) -> (i32, i32) {
    %c0_i32 = arith.constant 0 : i32
    %c0_i32_0 = arith.constant 0 : i32
    %c0_i32_1 = arith.constant 0 : i32
    return %c0_i32, %c0_i32_0 : i32, i32
  }
  func.func @transform_6(%arg0: i32, %arg1: i32) -> (i32, i32) {
    %c0_i32 = arith.constant 0 : i32
    %c0_i32_0 = arith.constant 0 : i32
    %c0_i32_1 = arith.constant 0 : i32
    return %c0_i32, %c0_i32_0 : i32, i32
  }
  func.func @transform_7(%arg0: i32, %arg1: i32) -> (i32, i32) {
    %c0_i32 = arith.constant 0 : i32
    %c0_i32_0 = arith.constant 0 : i32
    %c0_i32_1 = arith.constant 0 : i32
    return %c0_i32, %c0_i32_0 : i32, i32
  }
  func.func @transform_8(%arg0: i32, %arg1: i32) -> (i32, i32) {
    %c0_i32 = arith.constant 0 : i32
    %c0_i32_0 = arith.constant 0 : i32
    %c0_i32_1 = arith.constant 0 : i32
    return %c0_i32, %c0_i32_0 : i32, i32
  }
  func.func @transform_9(%arg0: i32, %arg1: i32) -> (i32, i32) {
    %c0_i32 = arith.constant 0 : i32
    %c0_i32_0 = arith.constant 0 : i32
    return %arg0, %c0_i32 : i32, i32
  }
  func.func @transform_10(%arg0: i32, %arg1: i32) -> (i32, i32) {
    %c0_i32 = arith.constant 0 : i32
    %c0_i32_0 = arith.constant 0 : i32
    return %arg0, %c0_i32 : i32, i32
  }
}

</mosaic_0001>

<bundles_post_ra>
// kernel: tpu_custom_call.1
= control target key start
LH: loop header
LB: loop body
LE: loop exit
PB: predicated region body
PF: predicated region fallthrough
CT: control target
= control target key end

     0   :  { %s3688_s0 = inlined_call_operand.hbm [shape: bf16[128,512], index: 0, kind: input, shape index: {}]   ;;  %s3689_s1 = inlined_call_operand.hbm [shape: bf16[512,256], index: 1, kind: input, shape index: {}]   ;;  %s3690_s2 = inlined_call_operand.vmem [shape: f32[1,256], index: 2, kind: input, shape index: {}]   ;;  %s3691_s3 = inlined_call_operand.hbm [shape: bf16[256,128], index: 3, kind: input, shape index: {}]   ;;  %s3692_s4 = inlined_call_operand.vmem [shape: f32[1,128], index: 4, kind: input, shape index: {}]   ;;  %s3693_s5 = inlined_call_operand.hbm [shape: bf16[128,256], index: 5, kind: input, shape index: {}]   ;;  %s3694_s6 = inlined_call_operand.vmem [shape: f32[1,256], index: 6, kind: input, shape index: {}]   ;;  %s3695_s7 = inlined_call_operand.hbm [shape: bf16[256,128], index: 7, kind: input, shape index: {}]   ;;  %s3696_s8 = inlined_call_operand.vmem [shape: f32[1,128], index: 8, kind: input, shape index: {}]   ;;  %s3697_s9 = inlined_call_operand.hbm [shape: f32[128,128], index: 9, kind: output, shape index: {0}]   ;;  %s3698_s10 = inlined_call_operand.hbm [shape: f32[128,256], index: 10, kind: output, shape index: {1}]  }
   0x1   :  { %3726 = sst [smem:[#allocation31_spill]] %s3688_s0 }
   0x2   :  { %3727 = sst [smem:[#allocation32_spill]] %s3689_s1 }
   0x3   :  { %3728 = sst [smem:[#allocation33_spill]] %s3690_s2 }
   0x4   :  { %3729 = sst [smem:[#allocation34_spill]] %s3691_s3 }
   0x5   :  { %3730 = sst [smem:[#allocation35_spill]] %s3692_s4 }
   0x6   :  { %3731 = sst [smem:[#allocation36_spill]] %s3693_s5 }
   0x7   :  { %3732 = sst [smem:[#allocation37_spill]] %s3694_s6 }
   0x8   :  { %3733 = sst [smem:[#allocation38_spill]] %s3695_s7 }
   0x9   :  { %3734 = sst [smem:[#allocation39_spill]] %s3696_s8 }
   0xa   :  { %3735 = sst [smem:[#allocation40_spill]] %s3697_s9 }
   0xb   :  { %3736 = sst [smem:[#allocation41_spill]] %s3698_s10 }
   0xc   :  { %16 = vsyncpa [#allocation4], 0 }
   0xd   :  { %18 = vsyncpa [#allocation4 + $0x1], 0 }
   0xe   :  { %19 = vsyncpa [#allocation7], 0 }
   0xf   :  { %21 = vsyncpa [#allocation7 + $0x1], 0 }
  0x10   :  { %22 = vsyncpa [#allocation10], 0 }
  0x11   :  { %23 = vsyncpa [#allocation5], 0 }
  0x12   :  { %25 = vsyncpa [#allocation5 + $0x1], 0 }
  0x13   :  { %26 = vsyncpa [#allocation14], 0 }
  0x14   :  { %28 = vsyncpa [#allocation14 + $0x1], 0  ;;  %s2926_s13 = smov 0   ;;  %s2928_s14 = smov 0  }
  0x15   :  { %s2930_s15 = smov 0   ;;  %s2932_s16 = smov 0  }
  0x16   :  { %s2934_s17 = smov 0   ;;  %s2936_s18 = smov 0  }
  0x17   :  { %s2938_s19 = smov 0   ;;  %s2940_s20 = smov 0  }
  0x18   :  { %s2942_s21 = smov 0   ;;  %s2944_s22 = smov 0  }
  0x19   :  { %s2946_s23 = smov 0   ;;  %s2948_s24 = smov 0  }
  0x1a   :  { %s2950_s25 = smov 0   ;;  %s2952_s26 = smov 0  }
  0x1b LB: > { %3737 = sst [smem:[#allocation21_spill]] %s2799_s13  ;;  %s2993_s27 = sadd.s32 4294967295, %s2851_s26   ;;  %s2851_s26 = sphi %s2952_s26, %s34_s26   ;;  %s2847_s25 = sphi %s2950_s25, %s3810_s25   ;;  %s2843_s24 = sphi %s2948_s24, %s3809_s24   ;;  %s2839_s23 = sphi %s2946_s23, %s3808_s23   ;;  %s2835_s22 = sphi %s2944_s22, %s3807_s22   ;;  %s2831_s21 = sphi %s2942_s21, %s3806_s21   ;;  %s2827_s20 = sphi %s2940_s20, %s3805_s20   ;;  %s2823_s19 = sphi %s2938_s19, %s3804_s19   ;;  %s2819_s18 = sphi %s2936_s18, %s3803_s18   ;;  %s2815_s17 = sphi %s2934_s17, %s3802_s17   ;;  %s2811_s16 = sphi %s2932_s16, %s3801_s16   ;;  %s2807_s15 = sphi %s2930_s15, %s3800_s15   ;;  %s2803_s14 = sphi %s2928_s14, %s3799_s14   ;;  %s2799_s13 = sphi %s2926_s13, %s3795_s13  }
  0x1c   : > { %3738 = sst [smem:[#allocation22_spill]] %s2803_s14  ;;  %s1901_s28 = sadd.s32 4294967294, %s2851_s26  }
  0x1d   : > { %3739 = sst [smem:[#allocation23_spill]] %s2835_s22  ;;  %p68_p0 = scmp.ne.s32.totalorder %s2827_s20, %s2823_s19 }
  0x1e   : > { %3740 = sst [smem:[#allocation24_spill]] %s2839_s23  ;;  %p3706_p1 = scmp.eq.s32.totalorder %s2993_s27, 0 }
  0x1f   : > { %3741 = sst [smem:[#allocation25_spill]] %s2993_s27  ;;  %p94_p2 = scmp.ne.s32.totalorder %s2815_s17, %s2811_s16 }
  0x20   : > { %p3002_p3 = por %p3706_p1, %p68_p0  ;;  %p264_p4 = scmp.ne.s32.totalorder %s2807_s15, %s2803_s14 }
  0x21   : > { %p3010_p5 = por %p94_p2, %p3706_p1  ;;  %p265_p6 = scmp.eq.s32.totalorder %s2993_s27, 3 }
  0x22   : > { %s3742_s30 = scalar_select %p3002_p3, 1, 0 }
  0x23   : > { %s3743_s11 = scalar_select %p3010_p5, 1, 0 }
  0x24   : > { %p270_p7 = scmp.ne.s32.totalorder %s2803_s14, %s2799_s13  ;;  %p271_p8 = scmp.eq.s32.totalorder %s1901_s28, 3 }
  0x25   : > { %3744 = sst [smem:[#allocation26_spill]] %s3743_s11  ;;  %p3017_p9 = por %p265_p6, %p264_p4 }
  0x26   : > { %p1902_p10 = scmp.ge.s32.totalorder %s2851_s26, 1  ;;  %p3022_p11 = por %p271_p8, %p270_p7 }
  0x27   : > { %s3745_s12 = scalar_select %p3017_p9, 1, 0 }
  0x28   : > { %s3747_s16 = scalar_select %p3022_p11, 1, 0 }
  0x29   : > { %3746 = sst [smem:[#allocation27_spill]] %s3745_s12  ;;  %p304_p12 = scmp.lt.s32.totalorder %s2851_s26, 5 }
  0x2a   : > { %3748 = sst [smem:[#allocation28_spill]] %s3747_s16  ;;  %s2853_s29 = smov [#allocation8]  }
  0x2b   : > { %p3027_p13 = pnand %p1902_p10, %p304_p12  ;;  %s319_s10 = sshll.u32 %s2853_s29, 4  ;;  %s320_s10 = int_to_ptr.vmem [resolvable:$true] %s319_s10 }
  0x2c   : > { %s2854_s13 = smov [#allocation9]   ;;  %s3751_s3 = sld [smem:[#allocation34_spill]] }
  0x2d   : > { %s3749_s19 = scalar_select %p3027_p13, 1, 0 }
  0x2e   : > { %p2179_p0 = pneg %p3027_p13  ;;  %s335_s9 = sshll.u32 %s2854_s13, 4  ;;  %s3039_s9 = int_to_ptr.vmem [resolvable:$true] %s335_s9 }
  0x30   : > { %p3035_p2 = pnand %p2179_p0, %p3706_p1 }
  0x32   : > { %s2517_s23 = scalar_lea.hbm %s3751_s3, 2048  ;;  %p3049_p6 = pneg %p3035_p2 }
  0x33   : > { %p2518_p4 = scmp.ne.s32.totalorder %s3751_s3, %s2517_s23  ;;  %p2524_p10 = scmp.lt.u32.totalorder %s2517_s23, %s3751_s3 }
  0x35   : > { %p2520_p7 = pnand %p3049_p6, %p2518_p4 }
  0x37   : > { %p2521_p8 = pneg %p2520_p7 }
  0x39   : > { %p2526_p12 = pnand %p2524_p10, %p2521_p8 }
  0x3b   : > { %2529 = shalt.err (!%p2526_p12)
}
  0x3c   : > { %s2530_s12 = scalar_lea.vmem %s320_s10, 2048  ;;  %p2538_p9 = scmp.lt.s32.totalorder %s320_s10, %s320_s10 }
  0x3d   : > { %p2531_p0 = scmp.ne.s32.totalorder %s320_s10, %s2530_s12  ;;  %p2539_p5 = scmp.lt.s32.totalorder %s2530_s12, %s2530_s12 }
  0x3f   : > { %p2533_p1 = pnand %p2531_p0, %p3049_p6  ;;  %p2540_p3 = por %p2539_p5, %p2538_p9 }
  0x41   : > { %p2534_p11 = pneg %p2533_p1 }
  0x43   : > { %p2541_p13 = pnand %p2540_p3, %p2534_p11 }
  0x45   : > { %2544 = shalt.err (!%p2541_p13)
}
  0x46   : > { %s3714_s6 = smov 64   ;;  %s3715_s8 = smov 4  }
  0x47   : > { %2182 = dma.hbm_to_vmem [thread:$0]  (!%p3035_p2), %s3751_s3, 2048, %s320_s10, [#allocation7], %s3714_s6, %s3714_s6, %s3715_s8  }
  0x48   : > { %s3753_s5 = sld [smem:[#allocation36_spill]] }
  0x4e   : > { %s2545_s2 = scalar_lea.hbm %s3753_s5, 2048 }
  0x4f   : > { %p2546_p1 = scmp.ne.s32.totalorder %s3753_s5, %s2545_s2  ;;  %p2552_p9 = scmp.lt.u32.totalorder %s2545_s2, %s3753_s5 }
  0x51   : > { %p2548_p3 = pnand %p2546_p1, %p3049_p6 }
  0x53   : > { %p2549_p5 = pneg %p2548_p3 }
  0x55   : > { %p2554_p11 = pnand %p2552_p9, %p2549_p5 }
  0x57   : > { %2557 = shalt.err (!%p2554_p11)
}
  0x58   : > { %s2558_s10 = scalar_lea.vmem %s3039_s9, 2048  ;;  %p2566_p8 = scmp.lt.s32.totalorder %s3039_s9, %s3039_s9 }
  0x59   : > { %p2559_p13 = scmp.ne.s32.totalorder %s3039_s9, %s2558_s10  ;;  %p2567_p10 = scmp.lt.s32.totalorder %s2558_s10, %s2558_s10 }
  0x5b   : > { %p2561_p4 = pnand %p2559_p13, %p3049_p6  ;;  %p2568_p12 = por %p2567_p10, %p2566_p8 }
  0x5d   : > { %p2562_p7 = pneg %p2561_p4 }
  0x5f   : > { %p2569_p0 = pnand %p2568_p12, %p2562_p7 }
  0x61   : > { %2572 = shalt.err (!%p2569_p0)
}
  0x62   : > { %s3716_s22 = smov 128   ;;  %s3718_s2 = smov 8  }
  0x63   : > { %2185 = dma.hbm_to_vmem [thread:$0]  (!%p3035_p2), %s3753_s5, 2048, %s3039_s9, [#allocation10], %s3716_s22, %s3716_s22, %s3718_s2  }
  0x64   : > { %s2859_s4 = smov [#allocation11]   ;;  %s3754_s7 = sld [smem:[#allocation38_spill]] }
  0x65   : > { %s351_s23 = sshll.u32 %s2859_s4, 4  ;;  %s352_s23 = int_to_ptr.vmem [resolvable:$true] %s351_s23 }
  0x6a   : > { %s2573_s12 = scalar_lea.hbm %s3754_s7, 2048 }
  0x6b   : > { %p2574_p1 = scmp.ne.s32.totalorder %s3754_s7, %s2573_s12  ;;  %p2580_p9 = scmp.lt.u32.totalorder %s2573_s12, %s3754_s7 }
  0x6d   : > { %p2576_p3 = pnand %p2574_p1, %p3049_p6 }
  0x6f   : > { %p2577_p5 = pneg %p2576_p3 }
  0x71   : > { %p2582_p11 = pnand %p2580_p9, %p2577_p5 }
  0x73   : > { %2585 = shalt.err (!%p2582_p11)
}
  0x74   : > { %s2586_s9 = scalar_lea.vmem %s352_s23, 2048  ;;  %p2594_p8 = scmp.lt.s32.totalorder %s352_s23, %s352_s23 }
  0x75   : > { %p2587_p13 = scmp.ne.s32.totalorder %s352_s23, %s2586_s9  ;;  %p2595_p10 = scmp.lt.s32.totalorder %s2586_s9, %s2586_s9 }
  0x77   : > { %p2589_p4 = pnand %p2587_p13, %p3049_p6  ;;  %p2596_p12 = por %p2595_p10, %p2594_p8 }
  0x79   : > { %p2590_p7 = pneg %p2589_p4 }
  0x7b   : > { %p2597_p0 = pnand %p2596_p12, %p2590_p7 }
  0x7d   : > { %2600 = shalt.err (!%p2597_p0)
}
  0x7e   : > { %s3755_s6 = smov 4   ;;  %s3756_s14 = smov 64  }
  0x7f   : > { %2188 = dma.hbm_to_vmem [thread:$0]  (!%p3035_p2), %s3754_s7, 2048, %s352_s23, [#allocation10], %s3756_s14, %s3756_s14, %s3755_s6  }
  0x80   : > { %s43_s28 = sadd.s32 1, %s2843_s24  ;;  %s46_s29 = sadd.s32 1, %s2847_s25 }
  0x81   : > { %p44_p6 = scmp.ge.s32.totalorder %s43_s28, 2  ;;  %s55_s11 = sadd.s32 1, %s2831_s21 }
  0x82   : > { %p62_p1 = scmp.ne.s32.totalorder %s2831_s21, %s2827_s20  ;;  %p3725_p2 = scmp.eq.s32.totalorder %s2851_s26, 0 }
  0x83   : > { %s3812_s28 = smov (%p44_p6, %s43_s28), 0  ;;  %s3814_s29 = smov (!%p44_p6, %s46_s29), %s2847_s25 }
  0x84   : > { %3757 = sst [smem:[#allocation29_spill]] %s3812_s28  ;;  %s3125_s4 = ssub.s32 %s2843_s24, %s3812_s28 }
  0x85   : > { %p48_p3 = scmp.ge.s32.totalorder %s3814_s29, 2  ;;  %p79_p5 = scmp.eq.s32.totalorder %s3125_s4, 0 }
  0x86   : > { %p3131_p9 = por %p3725_p2, %p62_p1  ;;  %p3724_p11 = scmp.lt.s32.totalorder %s2851_s26, 4 }
  0x87   : > { %s3816_s29 = smov (%p48_p3, %s3814_s29), 0  ;;  %s368_s16 = sand.u32 1, %s2831_s21  }
  0x88   : > { %3759 = sst [smem:[#allocation30_spill]] %s3816_s29  ;;  %s1909_s13 = sshll.u32 %s2843_s24, 1 }
  0x89   : > { %s50_s12 = ssub.s32 %s2847_s25, %s3816_s29  ;;  %s1907_s9 = sshll.u32 %s368_s16, 6 }
  0x8a   : > { %s52_s10 = sor.u32 %s3125_s4, %s50_s12  ;;  %p252_p13 = scmp.eq.s32.totalorder %s50_s12, 0 }
  0x8b   : > { %p53_p4 = scmp.eq.s32.totalorder %s52_s10, 0  ;;  %s3760_s6 = sadd.s32 1, %s2807_s15 }
  0x8c   : > { %s3146_s14 = scalar_select %p252_p13, %s2807_s15, %s3760_s6  }
  0x8d   : > { %s3149_s3 = scalar_select %p53_p4, %s2831_s21, %s55_s11  }
  0x8e   : > { %s2025_s8 = sshll.u32 %s2847_s25, 5  ;;  %s372_s2 = scalar_lea.vmem [#allocation3], %s1907_s9 }
  0x8f   : > { %s379_s22 = sadd.s32 %s2025_s8, %s1909_s13  ;;  %s382_s5 = sshll.u32 %s372_s2, 4  ;;  %s3152_s5 = int_to_ptr.vmem [resolvable:$true] %s382_s5 }
  0x90   : > { %s1911_s7 = sshll.u32 %s379_s22, 6  ;;  %s3761_s0 = sld [smem:[#allocation31_spill]] }
  0x91   : > { %p3163_p7 = pnand %p3724_p11, %p3131_p9  ;;  %s3167_s22 = scalar_lea.sflag [#allocation4], %s368_s16 }
  0x93   : > { %p2603_p10 = pneg %p3163_p7 }
  0x96   : > { %s3157_s29 = scalar_lea.hbm %s3761_s0, %s1911_s7  ;;  %s2606_s28 = scalar_lea.hbm %s3761_s0, 4096 }
  0x97   : > { %s2601_s2 = scalar_lea.hbm %s3157_s29, 1024  ;;  %p2607_p6 = scmp.lt.u32.totalorder %s3157_s29, %s3761_s0 }
  0x98   : > { %p2602_p8 = scmp.ne.s32.totalorder %s3157_s29, %s2601_s2  ;;  %p2608_p1 = scmp.lt.u32.totalorder %s2606_s28, %s2601_s2 }
  0x99   : > { %p2610_p9 = scmp.lt.u32.totalorder %s2601_s2, %s3157_s29 }
  0x9a   : > { %p2604_p12 = pnand %p2603_p10, %p2602_p8  ;;  %p2609_p3 = por %p2608_p1, %p2607_p6 }
  0x9c   : > { %p2605_p0 = pneg %p2604_p12  ;;  %p2611_p13 = por %p2610_p9, %p2609_p3 }
  0x9e   : > { %p2612_p4 = pnand %p2611_p13, %p2605_p0 }
  0xa0   : > { %2615 = shalt.err (!%p2612_p4)
}
  0xa1   : > { %s2616_s16 = scalar_lea.vmem %s3152_s5, 1024  ;;  %s2860_s12 = smov [#allocation3]  }
  0xa2   : > { %p2617_p8 = scmp.ne.s32.totalorder %s3152_s5, %s2616_s16  ;;  %s2621_s10 = sshll.u32 %s2860_s12, 4  ;;  %s2622_s10 = int_to_ptr.vmem [resolvable:$false] %s2621_s10 }
  0xa3   : > { %s2623_s9 = scalar_lea.vmem %s2622_s10, 2048  ;;  %p2624_p2 = scmp.lt.s32.totalorder %s3152_s5, %s2622_s10 }
  0xa4   : > { %p2619_p12 = pnand %p2617_p8, %p2603_p10  ;;  %p2625_p6 = scmp.lt.s32.totalorder %s2623_s9, %s2616_s16 }
  0xa6   : > { %p2620_p11 = pneg %p2619_p12  ;;  %p2626_p1 = por %p2625_p6, %p2624_p2 }
  0xa8   : > { %p2627_p3 = pnand %p2626_p1, %p2620_p11 }
  0xaa   : > { %2630 = shalt.err (!%p2627_p3)
}
  0xab   : > { %s2861_s6 = smov 256   ;;  %s3763_s8 = smov 8  }
  0xac   : > { %s3764_s2 = smov 128   ;;  %s81_s7 = sadd.s32 1, %s2819_s18 }
  0xad   : > { %2192 = dma.hbm_to_vmem [thread:$0]  (!%p3163_p7), %s3157_s29, 1024, %s3152_s5, %s3167_s22, %s2861_s6, %s3764_s2, %s3763_s8  }
  0xae   : > { %p88_p2 = scmp.ne.s32.totalorder %s2819_s18, %s2815_s17  ;;  %p3765_p11 = scmp.eq.s32.totalorder %s2851_s26, 0 }
  0xaf   : > { %s3203_s11 = scalar_select %p79_p5, %s2819_s18, %s81_s7  }
  0xb0   : > { %p90_p10 = por %p88_p2, %p3765_p11  ;;  %s392_s27 = sand.u32 1, %s2851_s26  }
  0xb1   : > { %s394_s28 = sand.u32 1, %s2819_s18   ;;  %s2027_s13 = sshll.u32 %s2843_s24, 12 }
  0xb2   : > { %s1912_s23 = sshll.u32 %s394_s28, 8  ;;  %s3766_s1 = sld [smem:[#allocation32_spill]] }
  0xb3   : > { %s396_s5 = scalar_lea.vmem [#allocation6], %s1912_s23  ;;  %p3767_p7 = scmp.lt.s32.totalorder %s2851_s26, 4 }
  0xb4   : > { %s404_s29 = sshll.u32 %s396_s5, 4  ;;  %s3223_s22 = scalar_lea.sflag [#allocation7], %s392_s27  ;;  %s3221_s29 = int_to_ptr.vmem [resolvable:$true] %s404_s29 }
  0xb5   : > { %p3217_p5 = pnand %p3767_p7, %p90_p10 }
  0xb7   : > { %p2633_p9 = pneg %p3217_p5 }
  0xb8   : > { %s3213_s10 = scalar_lea.hbm %s3766_s1, %s2027_s13  ;;  %s2636_s28 = scalar_lea.hbm %s3766_s1, 8192 }
  0xb9   : > { %s2631_s9 = scalar_lea.hbm %s3213_s10, 4096  ;;  %p2637_p8 = scmp.lt.u32.totalorder %s3213_s10, %s3766_s1 }
  0xba   : > { %p2632_p0 = scmp.ne.s32.totalorder %s3213_s10, %s2631_s9  ;;  %p2638_p12 = scmp.lt.u32.totalorder %s2636_s28, %s2631_s9 }
  0xbb   : > { %p2640_p1 = scmp.lt.u32.totalorder %s2631_s9, %s3213_s10 }
  0xbc   : > { %p2634_p13 = pnand %p2633_p9, %p2632_p0  ;;  %p2639_p6 = por %p2638_p12, %p2637_p8 }
  0xbe   : > { %p2635_p4 = pneg %p2634_p13  ;;  %p2641_p3 = por %p2640_p1, %p2639_p6 }
  0xc0   : > { %p2642_p2 = pnand %p2641_p3, %p2635_p4 }
  0xc2   : > { %2645 = shalt.err (!%p2642_p2)
}
  0xc3   : > { %s2646_s27 = scalar_lea.vmem %s3221_s29, 4096  ;;  %s2862_s16 = smov [#allocation6]  }
  0xc4   : > { %p2647_p11 = scmp.ne.s32.totalorder %s3221_s29, %s2646_s27  ;;  %s2651_s12 = sshll.u32 %s2862_s16, 4  ;;  %s2652_s12 = int_to_ptr.vmem [resolvable:$false] %s2651_s12 }
  0xc5   : > { %s2653_s5 = scalar_lea.vmem %s2652_s12, 8192  ;;  %p2654_p0 = scmp.lt.s32.totalorder %s3221_s29, %s2652_s12 }
  0xc6   : > { %p2649_p10 = pnand %p2647_p11, %p2633_p9  ;;  %p2655_p13 = scmp.lt.s32.totalorder %s2653_s5, %s2646_s27 }
  0xc8   : > { %p2650_p7 = pneg %p2649_p10  ;;  %p2656_p8 = por %p2655_p13, %p2654_p0 }
  0xca   : > { %p2657_p12 = pnand %p2656_p8, %p2650_p7 }
  0xcc   : > { %2660 = shalt.err (!%p2657_p12)
}
  0xcd   : > { %2195 = dma.hbm_to_vmem [thread:$0]  (!%p3217_p5), %s3213_s10, 4096, %s3221_s29, %s3223_s22, %s3764_s2, %s3764_s2, %s3763_s8  }
  0xce   : > { %p3769_p9 = scmp.ne.s32.totalorder %s3749_s19, 0 }
  0xcf   : > { %s418_s9 = sand.u32 (!%p3769_p9), 1, %s2827_s20   ;;  %p3770_p4 = scmp.ne.s32.totalorder (!%p3769_p9), %s3742_s30, 0 }
  0xd0   : > { %416 = sbr.rel (%p3769_p9) target bundleno = 1614 (0x64e), region = 56  ;;  %s1917_s6 = sshll.u32 (!%p3769_p9), %s418_s9, 6 }
  0xd1   : > { %s419_s7 = scalar_lea.sflag (!%p3769_p9), [#allocation4], %s418_s9  ;;  %s3257_s28 = scalar_lea.vmem (!%p3769_p9), [#allocation3], %s1917_s6 }
  0xd7   : > { %2774 = dma.done.wait (%p3770_p4), %s419_s7, 1024  }
  0xd8   : > { %2776 = vsyncadd (%p3770_p4), %s419_s7, 4294966272  ;;  %s3771_s4 = sld [smem:[#allocation25_spill]]  ;;  %s3772_s23 = sld [smem:[#allocation26_spill]] }
  0xd9   : > { %s429_s8 = sand.u32 1, %s2815_s17  }
  0xda   : > { %s1918_s2 = sshll.u32 %s429_s8, 8 }
  0xdb   : > { %s3265_s10 = scalar_lea.vmem [#allocation6], %s1918_s2 }
  0xde   : > { %s427_s13 = sand.u32 1, %s3771_s4   ;;  %p3773_p5 = scmp.ne.s32.totalorder %s3772_s23, 0 }
  0xdf   : > { %s428_s19 = scalar_lea.sflag [#allocation7], %s427_s13 }
  0xe0   : > { %2778 = dma.done.wait (%p3773_p5), %s428_s19, 4096  }
  0xe1   : > { %2780 = vsyncadd (%p3773_p5), %s428_s19, 4294963200  ;;  %p3774_p6 = scmp.eq.s32.totalorder %s3771_s4, 0 }
  0xe3   : > { %2782 = dma.done.wait (%p3774_p6), [#allocation7], 2048   ;;  %p3775_p1 = pmov %p3774_p6 }
  0xe5   : > { %2784 = vsyncadd (%p3775_p1), [#allocation7], 4294965248  ;;  %p3776_p3 = pmov %p3775_p1 }
  0xe6   : > { %p3777_p2 = pmov %p3775_p1 }
  0xe7   : > { %2786 = dma.done.wait (%p3776_p3), [#allocation10], 4096  }
  0xe8   : > { %2788 = vsyncadd (%p3777_p2), [#allocation10], 4294963200  ;;  %s3778_s30 = sld [smem:[#allocation22_spill]]  ;;  %s3779_s5 = sld [smem:[#allocation23_spill]] }
  0xee   : > { %s3280_s29 = sand.u32 1, %s3778_s30   ;;  %p1924_p11 = scmp.ne.s32.totalorder %s3779_s5, 0 }
  0xef   : > { %s1922_s22 = sshll.u32 %s3280_s29, 6  ;;  %s1923_s27 = sshll.u32 %s3280_s29, 7  ;;  %v2863_v0 = vmov (!%p1924_p11), 0.0  }
  0xf0   : > { %s3284_s16 = scalar_lea.vmem [#allocation12], %s1922_s22  ;;  %s3286_s12 = scalar_lea.vmem [#allocation13], %s1923_s27  ;;  %500 = vst [vmem:[#allocation2] sm:$0xff] (!%p1924_p11), %v2863_v0  ;;  %501 = vst [vmem:[#allocation2 + $0x8] sm:$0xff] (!%p1924_p11), %v2863_v0 }
  0xf1   : > { %499 = sbr.rel (%p1924_p11) target bundleno = 248 (0xf8), region = 80  ;;  %502 = vst [vmem:[#allocation2 + $0x10] sm:$0xff] (!%p1924_p11), %v2863_v0  ;;  %503 = vst [vmem:[#allocation2 + $0x18] sm:$0xff] (!%p1924_p11), %v2863_v0 }
  0xf2   : > { %504 = vst [vmem:[#allocation2 + $0x20] sm:$0xff] (!%p1924_p11), %v2863_v0  ;;  %505 = vst [vmem:[#allocation2 + $0x28] sm:$0xff] (!%p1924_p11), %v2863_v0 }
  0xf3   : > { %506 = vst [vmem:[#allocation2 + $0x30] sm:$0xff] (!%p1924_p11), %v2863_v0  ;;  %507 = vst [vmem:[#allocation2 + $0x38] sm:$0xff] (!%p1924_p11), %v2863_v0 }
  0xf4   : > { %508 = vst [vmem:[#allocation2 + $0x40] sm:$0xff] (!%p1924_p11), %v2863_v0  ;;  %509 = vst [vmem:[#allocation2 + $0x48] sm:$0xff] (!%p1924_p11), %v2863_v0 }
  0xf5   : > { %510 = vst [vmem:[#allocation2 + $0x50] sm:$0xff] (!%p1924_p11), %v2863_v0  ;;  %511 = vst [vmem:[#allocation2 + $0x58] sm:$0xff] (!%p1924_p11), %v2863_v0 }
  0xf6   : > { %512 = vst [vmem:[#allocation2 + $0x60] sm:$0xff] (!%p1924_p11), %v2863_v0  ;;  %513 = vst [vmem:[#allocation2 + $0x68] sm:$0xff] (!%p1924_p11), %v2863_v0 }
  0xf7   : > { %514 = vst [vmem:[#allocation2 + $0x70] sm:$0xff] (!%p1924_p11), %v2863_v0  ;;  %515 = vst [vmem:[#allocation2 + $0x78] sm:$0xff] (!%p1924_p11), %v2863_v0 }
  0xf8 PF: > { %v2337_v1 = vld [vmem:[%s3265_s10 + $0x4] ss:$8 sps:$4 sm:$0xff]   ;;  %v2339_v2 = vld [vmem:[%s3265_s10] ss:$8 sps:$4 sm:$0xff]   ;;  %v2340_v3 = vld [vmem:[%s3265_s10 + $0x14] ss:$8 sps:$4 sm:$0xff]  }
  0xf9   : > { %772 = vmatprep.subr.bf16.mxu0 %v2337_v1  ;;  %2111 = vmatprep.subr.bf16.mxu1 %v2337_v1  ;;  %v2342_v4 = vld [vmem:[%s3265_s10 + $0x10] ss:$8 sps:$4 sm:$0xff]   ;;  %v2343_v5 = vld [vmem:[%s3265_s10 + $0x24] ss:$8 sps:$4 sm:$0xff]   ;;  %v2345_v6 = vld [vmem:[%s3265_s10 + $0x20] ss:$8 sps:$4 sm:$0xff]  }
  0xfa   : > { %773 = vmatpush1.bf16.msra.mxu0 %v2339_v2  ;;  %2127 = vmatpush1.bf16.msra.mxu1 %v2339_v2  ;;  %v2346_v7 = vld [vmem:[%s3265_s10 + $0x34] ss:$8 sps:$4 sm:$0xff]   ;;  %v2348_v8 = vld [vmem:[%s3265_s10 + $0x30] ss:$8 sps:$4 sm:$0xff]   ;;  %v2349_v9 = vld [vmem:[%s3265_s10 + $0x44] ss:$8 sps:$4 sm:$0xff]  }
  0xfb   : > { %774 = vmatprep.subr.bf16.mxu0 %v2340_v3  ;;  %2112 = vmatprep.subr.bf16.mxu1 %v2340_v3  ;;  %v2351_v10 = vld [vmem:[%s3265_s10 + $0x40] ss:$8 sps:$4 sm:$0xff]   ;;  %v2352_v11 = vld [vmem:[%s3265_s10 + $0x54] ss:$8 sps:$4 sm:$0xff]   ;;  %v2354_v12 = vld [vmem:[%s3265_s10 + $0x50] ss:$8 sps:$4 sm:$0xff]  }
  0xfc   : > { %v2355_v13 = vld [vmem:[%s3265_s10 + $0x64] ss:$8 sps:$4 sm:$0xff]   ;;  %v2357_v15 = vld [vmem:[%s3265_s10 + $0x60] ss:$8 sps:$4 sm:$0xff]   ;;  %v2358_v17 = vld [vmem:[%s3265_s10 + $0x74] ss:$8 sps:$4 sm:$0xff]  }
  0xfd   : > { %v2387_v14 = vld [vmem:[%s3257_s28 + $0x4] ss:$8 sps:$4 sm:$0xff]   ;;  %v2360_v18 = vld [vmem:[%s3265_s10 + $0x70] ss:$8 sps:$4 sm:$0xff]   ;;  %v2363_v20 = vld [vmem:[%s3265_s10 + $0x80] ss:$8 sps:$4 sm:$0xff]  }
  0xfe   : > { %775 = vmatpush1.bf16.msra.mxu0 %v2342_v4  ;;  %2128 = vmatpush1.bf16.msra.mxu1 %v2342_v4  ;;  %v2390_v16 = vld [vmem:[%s3257_s28 + $0x24] ss:$8 sps:$4 sm:$0xff]   ;;  %v2364_v21 = vld [vmem:[%s3265_s10 + $0x94] ss:$8 sps:$4 sm:$0xff]   ;;  %v2366_v22 = vld [vmem:[%s3265_s10 + $0x90] ss:$8 sps:$4 sm:$0xff]  }
  0xff   : > { %776 = vmatprep.subr.bf16.mxu0 %v2343_v5  ;;  %2113 = vmatprep.subr.bf16.mxu1 %v2343_v5  ;;  %v2361_v19 = vld [vmem:[%s3265_s10 + $0x84] ss:$8 sps:$4 sm:$0xff]   ;;  %v2369_v24 = vld [vmem:[%s3265_s10 + $0xa0] ss:$8 sps:$4 sm:$0xff]   ;;  %v2370_v25 = vld [vmem:[%s3265_s10 + $0xb4] ss:$8 sps:$4 sm:$0xff]  }
 0x100   : > { %804 = vmatprep.mubr.bf16.mxu0 %v2387_v14  ;;  %824 = vmatprep.mubr.bf16.mxu1 %v2390_v16  ;;  %v2367_v23 = vld [vmem:[%s3265_s10 + $0xa4] ss:$8 sps:$4 sm:$0xff]   ;;  %v2372_v26 = vld [vmem:[%s3265_s10 + $0xb0] ss:$8 sps:$4 sm:$0xff]   ;;  %v2375_v28 = vld [vmem:[%s3265_s10 + $0xc0] ss:$8 sps:$4 sm:$0xff]  }
 0x101   : > { %v2373_v27 = vld [vmem:[%s3265_s10 + $0xc4] ss:$8 sps:$4 sm:$0xff]   ;;  %v2376_v29 = vld [vmem:[%s3265_s10 + $0xd4] ss:$8 sps:$4 sm:$0xff]   ;;  %v2378_v30 = vld [vmem:[%s3265_s10 + $0xd0] ss:$8 sps:$4 sm:$0xff]  }
 0x102   : > { %777 = vmatpush1.bf16.msra.mxu0 %v2345_v6  ;;  %2129 = vmatpush1.bf16.msra.mxu1 %v2345_v6  ;;  %v2379_v31 = vld [vmem:[%s3265_s10 + $0xe4] ss:$8 sps:$4 sm:$0xff]   ;;  %v2381_v32 = vld [vmem:[%s3265_s10 + $0xe0] ss:$8 sps:$4 sm:$0xff]   ;;  %v2382_v33 = vld [vmem:[%s3265_s10 + $0xf4] ss:$8 sps:$4 sm:$0xff]  }
 0x103   : > { %778 = vmatprep.subr.bf16.mxu0 %v2346_v7  ;;  %2114 = vmatprep.subr.bf16.mxu1 %v2346_v7  ;;  %v2384_v34 = vld [vmem:[%s3265_s10 + $0xf0] ss:$8 sps:$4 sm:$0xff]   ;;  %v2385_v35 = vld [vmem:[%s3257_s28] ss:$8 sps:$4 sm:$0xff]   ;;  %v2391_v37 = vld [vmem:[%s3257_s28 + $0x14] ss:$8 sps:$4 sm:$0xff]  }
 0x104   : > { %v2388_v36 = vld [vmem:[%s3257_s28 + $0x20] ss:$8 sps:$4 sm:$0xff]   ;;  %v2393_v38 = vld [vmem:[%s3257_s28 + $0x34] ss:$8 sps:$4 sm:$0xff]   ;;  %v2395_v39 = vld [vmem:[%s3257_s28 + $0x10] ss:$8 sps:$4 sm:$0xff]  }
 0x105   : > { %v2396_v40 = vld [vmem:[%s3257_s28 + $0x30] ss:$8 sps:$4 sm:$0xff]   ;;  %v516_v41 = vld [vmem:[#allocation2] sm:$0xff]  ;;  %v517_v43 = vld [vmem:[#allocation2 + $0x8] sm:$0xff]  ;;  %s3780_s9 = sld [smem:[#allocation23_spill]] }
 0x106   : > { %779 = vmatpush1.bf16.msra.mxu0 %v2348_v8  ;;  %2130 = vmatpush1.bf16.msra.mxu1 %v2348_v8  ;;  %v524_v42 = vld [vmem:[#allocation2 + $0x40] sm:$0xff]  ;;  %v525_v44 = vld [vmem:[#allocation2 + $0x48] sm:$0xff]  ;;  %v518_v47 = vld [vmem:[#allocation2 + $0x10] sm:$0xff] }
 0x107   : > { %780 = vmatprep.subr.bf16.mxu0 %v2349_v9  ;;  %2115 = vmatprep.subr.bf16.mxu1 %v2349_v9  ;;  %v526_v48 = vld [vmem:[#allocation2 + $0x50] sm:$0xff]  ;;  %v519_v53 = vld [vmem:[#allocation2 + $0x18] sm:$0xff]  ;;  %v520_v1 = vld [vmem:[#allocation2 + $0x20] sm:$0xff] }
 0x108   : > { %v527_v54 = vld [vmem:[#allocation2 + $0x58] sm:$0xff]  ;;  %v528_v2 = vld [vmem:[#allocation2 + $0x60] sm:$0xff]  ;;  %v521_v3 = vld [vmem:[#allocation2 + $0x28] sm:$0xff] }
 0x109   : > { %v529_v4 = vld [vmem:[#allocation2 + $0x68] sm:$0xff]  ;;  %v522_v7 = vld [vmem:[#allocation2 + $0x30] sm:$0xff]  ;;  %v531_v14 = vld [vmem:[#allocation2 + $0x78] sm:$0xff] }
 0x10a   : > { %781 = vmatpush1.bf16.msra.mxu0 %v2351_v10  ;;  %2131 = vmatpush1.bf16.msra.mxu1 %v2351_v10  ;;  %v530_v8 = vld [vmem:[#allocation2 + $0x70] sm:$0xff] }
 0x10b   : > { %782 = vmatprep.subr.bf16.mxu0 %v2352_v11  ;;  %2116 = vmatprep.subr.bf16.mxu1 %v2352_v11  ;;  %p1965_p10 = scmp.ne.s32.totalorder %s3780_s9, 1 }
 0x10c   : > { %s3781_s28 = sld [smem:[#allocation33_spill]] (!%p1965_p10)  ;;  %s3782_s13 = sld [smem:[#allocation35_spill]] (!%p1965_p10) }
 0x10d   : > { %s3783_s19 = sld [smem:[#allocation37_spill]] (!%p1965_p10)  ;;  %s3784_s22 = sld [smem:[#allocation39_spill]] (!%p1965_p10) }
 0x10e   : > { %783 = vmatpush1.bf16.msra.mxu0 %v2354_v12  ;;  %2132 = vmatpush1.bf16.msra.mxu1 %v2354_v12 }
 0x10f   : > { %784 = vmatprep.subr.bf16.mxu0 %v2355_v13  ;;  %2117 = vmatprep.subr.bf16.mxu1 %v2355_v13  ;;  %v523_v13 = vld [vmem:[#allocation2 + $0x38] sm:$0xff] }
 0x112   : > { %785 = vmatpush1.bf16.msra.mxu0 %v2357_v15  ;;  %2133 = vmatpush1.bf16.msra.mxu1 %v2357_v15 }
 0x113   : > { %786 = vmatprep.subr.bf16.mxu0 %v2358_v17  ;;  %2118 = vmatprep.subr.bf16.mxu1 %v2358_v17 }
 0x116   : > { %787 = vmatpush1.bf16.msra.mxu0 %v2360_v18  ;;  %2134 = vmatpush1.bf16.msra.mxu1 %v2360_v18 }
 0x117   : > { %788 = vmatprep.subr.bf16.mxu0 %v2361_v19  ;;  %2119 = vmatprep.subr.bf16.mxu1 %v2361_v19 }
 0x11a   : > { %789 = vmatpush1.bf16.msra.mxu0 %v2363_v20  ;;  %2135 = vmatpush1.bf16.msra.mxu1 %v2363_v20 }
 0x11b   : > { %790 = vmatprep.subr.bf16.mxu0 %v2364_v21  ;;  %2120 = vmatprep.subr.bf16.mxu1 %v2364_v21 }
 0x11e   : > { %791 = vmatpush1.bf16.msra.mxu0 %v2366_v22  ;;  %2136 = vmatpush1.bf16.msra.mxu1 %v2366_v22 }
 0x11f   : > { %792 = vmatprep.subr.bf16.mxu0 %v2367_v23  ;;  %2121 = vmatprep.subr.bf16.mxu1 %v2367_v23 }
 0x122   : > { %793 = vmatpush1.bf16.msra.mxu0 %v2369_v24  ;;  %2137 = vmatpush1.bf16.msra.mxu1 %v2369_v24 }
 0x123   : > { %794 = vmatprep.subr.bf16.mxu0 %v2370_v25  ;;  %2122 = vmatprep.subr.bf16.mxu1 %v2370_v25  ;;  %v2397_v25 = vld [vmem:[#allocation8 + $0x40] sm:$0xff] (!%p1965_p10)  }
 0x126   : > { %795 = vmatpush1.bf16.msra.mxu0 %v2372_v26  ;;  %2138 = vmatpush1.bf16.msra.mxu1 %v2372_v26  ;;  %v2398_v26 = vld [vmem:[#allocation8] sm:$0xff] (!%p1965_p10)  }
 0x127   : > { %796 = vmatprep.subr.bf16.mxu0 %v2373_v27  ;;  %2123 = vmatprep.subr.bf16.mxu1 %v2373_v27  ;;  %v2399_v27 = vld [vmem:[#allocation8 + $0x48] sm:$0xff] (!%p1965_p10)  }
 0x12a   : > { %797 = vmatpush1.bf16.msra.mxu0 %v2375_v28  ;;  %2139 = vmatpush1.bf16.msra.mxu1 %v2375_v28  ;;  %v2400_v28 = vld [vmem:[#allocation8 + $0x8] sm:$0xff] (!%p1965_p10)  }
 0x12b   : > { %798 = vmatprep.subr.bf16.mxu0 %v2376_v29  ;;  %2124 = vmatprep.subr.bf16.mxu1 %v2376_v29  ;;  %v2401_v29 = vld [vmem:[#allocation8 + $0x50] sm:$0xff] (!%p1965_p10)  }
 0x12e   : > { %799 = vmatpush1.bf16.msra.mxu0 %v2378_v30  ;;  %2140 = vmatpush1.bf16.msra.mxu1 %v2378_v30  ;;  %v899_v30 = vlaneseq (!%p1965_p10) }
 0x12f   : > { %800 = vmatprep.subr.bf16.mxu0 %v2379_v31  ;;  %2125 = vmatprep.subr.bf16.mxu1 %v2379_v31  ;;  %v2402_v31 = vld [vmem:[#allocation8 + $0x10] sm:$0xff] (!%p1965_p10)  }
 0x132   : > { %801 = vmatpush1.bf16.msra.mxu0 %v2381_v32  ;;  %2141 = vmatpush1.bf16.msra.mxu1 %v2381_v32  ;;  %v2403_v32 = vld [vmem:[#allocation8 + $0x58] sm:$0xff] (!%p1965_p10)  }
 0x133   : > { %802 = vmatprep.subr.bf16.mxu0 %v2382_v33  ;;  %2126 = vmatprep.subr.bf16.mxu1 %v2382_v33  ;;  %v3330_v33 = vshrl.u32 (!%p1965_p10), %v899_v30, 7  ;;  %v2422_v30 = vld [vmem:[#allocation9 + $0x34] ss:$8 sps:$4 sm:$0xff] (!%p1965_p10)  }
 0x136   : > { %803 = vmatpush1.bf16.msra.mxu0 %v2384_v34  ;;  %2142 = vmatpush1.bf16.msra.mxu1 %v2384_v34  ;;  %v2404_v34 = vld [vmem:[#allocation8 + $0x18] sm:$0xff] (!%p1965_p10)  }
 0x137   : > { %2031 = vmatprep.subr.bf16.mxu0 (!%p1965_p10), %v2397_v25 }
 0x139   : > { %805 = vmatmul.mubr.bf16.vlgmr.msra.gmra.mrb[0].mxu0 %v2385_v35  ;;  %825 = vmatmul.mubr.bf16.vlgmr.msra.gmra.mrb[0].mxu1 %v2388_v36  ;;  %v2405_v35 = vld [vmem:[#allocation8 + $0x60] sm:$0xff] (!%p1965_p10)   ;;  %v905_v36 = vsub.s32 (!%p1965_p10), 1, %v3330_v33 }
 0x13a   : > { %814 = vmatprep.mubr.bf16.mxu0 %v2391_v37  ;;  %834 = vmatprep.mubr.bf16.mxu1 %v2393_v38  ;;  %v2406_v37 = vld [vmem:[#allocation8 + $0x20] sm:$0xff] (!%p1965_p10)   ;;  %v2407_v38 = vld [vmem:[#allocation8 + $0x68] sm:$0xff] (!%p1965_p10)  }
 0x13b   : > { %2032 = vmatpush3.bf16.msra.mxu0 (!%p1965_p10), %v2398_v26 }
 0x13c   : > { %2033 = vmatprep.subr.bf16.mxu0 (!%p1965_p10), %v2399_v27 }
 0x13f   : > { %2034 = vmatpush3.bf16.msra.mxu0 (!%p1965_p10), %v2400_v28 }
 0x140   : > { %2035 = vmatprep.subr.bf16.mxu0 (!%p1965_p10), %v2401_v29 }
 0x141   : > { %815 = vmatmul.mubr.bf16.gmra.mrb[4].mxu0 %v2395_v39  ;;  %835 = vmatmul.mubr.bf16.gmra.mrb[4].mxu1 %v2396_v40 }
 0x143   : > { %2036 = vmatpush3.bf16.msra.mxu0 (!%p1965_p10), %v2402_v31  ;;  %v2424_v31 = vld [vmem:[#allocation9 + $0x30] ss:$8 sps:$4 sm:$0xff] (!%p1965_p10)  }
 0x144   : > { %2037 = vmatprep.subr.bf16.mxu0 (!%p1965_p10), %v2403_v32  ;;  %v2425_v32 = vld [vmem:[#allocation9 + $0x44] ss:$8 sps:$4 sm:$0xff] (!%p1965_p10)  }
 0x147   : > { %2038 = vmatpush3.bf16.msra.mxu0 (!%p1965_p10), %v2404_v34  ;;  %v2427_v34 = vld [vmem:[#allocation9 + $0x40] ss:$8 sps:$4 sm:$0xff] (!%p1965_p10)  }
 0x148   : > { %2039 = vmatprep.subr.bf16.mxu0 (!%p1965_p10), %v2405_v35  ;;  %v2428_v35 = vld [vmem:[#allocation9 + $0x54] ss:$8 sps:$4 sm:$0xff] (!%p1965_p10)  }
 0x14b   : > { %2040 = vmatpush3.bf16.msra.mxu0 (!%p1965_p10), %v2406_v37  ;;  %v2430_v37 = vld [vmem:[#allocation9 + $0x50] ss:$8 sps:$4 sm:$0xff] (!%p1965_p10)  }
 0x14c   : > { %2041 = vmatprep.subr.bf16.mxu0 (!%p1965_p10), %v2407_v38  ;;  %v2431_v38 = vld [vmem:[#allocation9 + $0x64] ss:$8 sps:$4 sm:$0xff] (!%p1965_p10)  }
 0x20c   : > { %v806_v45 = vpop.f32.mrb[0].mxu0  ;;  %v826_v46 = vpop.f32.mrb[0].mxu1 }
 0x20d   : > { %v845_v49 = vadd.f32 %v806_v45, %v516_v41  ;;  %v853_v50 = vadd.f32 %v826_v46, %v524_v42  ;;  %v808_v51 = vpop.f32.mrb[1].mxu0  ;;  %v828_v52 = vpop.f32.mrb[1].mxu1  ;;  %v897_v41 = vld [vmem:[%s3781_s28] sm:$0x3] (!%p1965_p10) }
 0x20e   : > { %v846_v55 = vadd.f32 %v808_v51, %v517_v43  ;;  %v854_v56 = vadd.f32 %v828_v52, %v525_v44  ;;  %v810_v57 = vpop.f32.mrb[2].mxu0  ;;  %v830_v58 = vpop.f32.mrb[2].mxu1  ;;  %v906_v42 = vrot.slane (!%p1965_p10), %v897_v41, %v905_v36  ;;  %v901_v43 = vsub.s32 (!%p1965_p10), 0, %v3330_v33  ;;  %v2408_v44 = vld [vmem:[#allocation8 + $0x28] sm:$0xff] (!%p1965_p10)   ;;  %v2411_v52 = vld [vmem:[#allocation8 + $0x78] sm:$0xff] (!%p1965_p10)  }
 0x20f   : > { %861 = vst [vmem:[#allocation2] sm:$0xff] %v845_v49  ;;  %869 = vst [vmem:[#allocation2 + $0x40] sm:$0xff] %v853_v50  ;;  %v847_v59 = vadd.f32 %v810_v57, %v518_v47  ;;  %v855_v60 = vadd.f32 %v830_v58, %v526_v48  ;;  %v812_v61 = vpop.f32.mrb[3].mxu0  ;;  %v832_v62 = vpop.f32.mrb[3].mxu1  ;;  %v2409_v47 = vld [vmem:[#allocation8 + $0x70] sm:$0xff] (!%p1965_p10)   ;;  %2042 = vmatpush3.bf16.msra.mxu0 (!%p1965_p10), %v2408_v44 }
 0x210   : > { %862 = vst [vmem:[#allocation2 + $0x8] sm:$0xff] %v846_v55  ;;  %870 = vst [vmem:[#allocation2 + $0x48] sm:$0xff] %v854_v56  ;;  %v848_v63 = vadd.f32 %v812_v61, %v519_v53  ;;  %v856_v0 = vadd.f32 %v832_v62, %v527_v54  ;;  %v2410_v48 = vld [vmem:[#allocation8 + $0x30] sm:$0xff] (!%p1965_p10)   ;;  %v902_v53 = vrot.slane (!%p1965_p10), %v897_v41, %v901_v43  ;;  %v2413_v55 = vld [vmem:[#allocation9 + $0x4] ss:$8 sps:$4 sm:$0xff] (!%p1965_p10)   ;;  %2043 = vmatprep.subr.bf16.mxu0 (!%p1965_p10), %v2409_v47 }
 0x211   : > { %863 = vst [vmem:[#allocation2 + $0x10] sm:$0xff] %v847_v59  ;;  %871 = vst [vmem:[#allocation2 + $0x50] sm:$0xff] %v855_v60  ;;  %v2415_v56 = vld [vmem:[#allocation9] ss:$8 sps:$4 sm:$0xff] (!%p1965_p10)   ;;  %v2416_v57 = vld [vmem:[#allocation9 + $0x14] ss:$8 sps:$4 sm:$0xff] (!%p1965_p10)   ;;  %1253 = vmatprep.subr.bf16.mxu1 (!%p1965_p10), %v2413_v55 }
 0x212   : > { %864 = vst [vmem:[#allocation2 + $0x18] sm:$0xff] %v848_v63  ;;  %872 = vst [vmem:[#allocation2 + $0x58] sm:$0xff] %v856_v0  ;;  %v2412_v59 = vld [vmem:[#allocation8 + $0x38] sm:$0xff] (!%p1965_p10)   ;;  %1254 = vmatpush1.bf16.msra.mxu1 (!%p1965_p10), %v2415_v56  ;;  %v2419_v61 = vld [vmem:[#allocation9 + $0x24] ss:$8 sps:$4 sm:$0xff] (!%p1965_p10)  }
 0x213   : > { %v2418_v60 = vld [vmem:[#allocation9 + $0x10] ss:$8 sps:$4 sm:$0xff] (!%p1965_p10)   ;;  %1255 = vmatprep.subr.bf16.mxu1 (!%p1965_p10), %v2416_v57  ;;  %2044 = vmatpush3.bf16.msra.mxu0 (!%p1965_p10), %v2410_v48  ;;  %v1966_v47 = vld [vmem:[%s3782_s13] ss:$0 sm:$0xff] (!%p1965_p10) }
 0x214   : > { %v816_v5 = vpop.f32.mrb[4].mxu0  ;;  %v836_v6 = vpop.f32.mrb[4].mxu1  ;;  %880 = sbr.rel (%p1965_p10) target bundleno = 1560 (0x618), region = 84  ;;  %2045 = vmatprep.subr.bf16.mxu0 (!%p1965_p10), %v2411_v52  ;;  %v2436_v41 = vld [vmem:[#allocation9 + $0x70] ss:$8 sps:$4 sm:$0xff] (!%p1965_p10)  }
 0x215   : > { %v849_v9 = vadd.f32 %v816_v5, %v520_v1  ;;  %v857_v10 = vadd.f32 %v836_v6, %v528_v2  ;;  %v818_v11 = vpop.f32.mrb[5].mxu0  ;;  %v838_v12 = vpop.f32.mrb[5].mxu1  ;;  %v2421_v2 = vld [vmem:[#allocation9 + $0x20] ss:$8 sps:$4 sm:$0xff] (!%p1965_p10)  }
 0x216   : > { %v850_v15 = vadd.f32 %v818_v11, %v521_v3  ;;  %v858_v16 = vadd.f32 %v838_v12, %v529_v4  ;;  %v820_v17 = vpop.f32.mrb[6].mxu0  ;;  %v840_v18 = vpop.f32.mrb[6].mxu1  ;;  %v881_v50 = vld [vmem:[#allocation2] sm:$0xff] (!%p1965_p10)  ;;  %1256 = vmatpush1.bf16.msra.mxu1 (!%p1965_p10), %v2418_v60 }
 0x217   : > { %865 = vst [vmem:[#allocation2 + $0x20] sm:$0xff] %v849_v9  ;;  %873 = vst [vmem:[#allocation2 + $0x60] sm:$0xff] %v857_v10  ;;  %v851_v19 = vadd.f32 %v820_v17, %v522_v7  ;;  %v859_v20 = vadd.f32 %v840_v18, %v530_v8  ;;  %v822_v21 = vpop.f32.mrb[7].mxu0  ;;  %v842_v22 = vpop.f32.mrb[7].mxu1  ;;  %v882_v39 = vld [vmem:[#allocation2 + $0x8] sm:$0xff] (!%p1965_p10)  ;;  %v3347_v62 = vadd.f32 (!%p1965_p10), %v902_v53, %v881_v50  ;;  %1257 = vmatprep.subr.bf16.mxu1 (!%p1965_p10), %v2419_v61 }
 0x218   : > { %866 = vst [vmem:[#allocation2 + $0x28] sm:$0xff] %v850_v15  ;;  %874 = vst [vmem:[#allocation2 + $0x68] sm:$0xff] %v858_v16  ;;  %v852_v23 = vadd.f32 %v822_v21, %v523_v13  ;;  %v860_v24 = vadd.f32 %v842_v22, %v531_v14  ;;  %v3339_v45 = vadd.f32 (!%p1965_p10), %v906_v42, %v882_v39  ;;  %v883_v51 = vld [vmem:[#allocation2 + $0x10] sm:$0xff] (!%p1965_p10)  ;;  %v890_v6 = vld [vmem:[#allocation2 + $0x48] sm:$0xff] (!%p1965_p10)  ;;  %2046 = vmatpush3.bf16.msra.mxu0 (!%p1965_p10), %v2412_v59 }
 0x219   : > { %867 = vst [vmem:[#allocation2 + $0x30] sm:$0xff] %v851_v19  ;;  %875 = vst [vmem:[#allocation2 + $0x70] sm:$0xff] %v859_v20  ;;  %v884_v40 = vld [vmem:[#allocation2 + $0x18] sm:$0xff] (!%p1965_p10)  ;;  %v3349_v63 = vadd.f32 (!%p1965_p10), %v902_v53, %v883_v51  ;;  %v3363_v11 = vadd.f32 (!%p1965_p10), %v906_v42, %v890_v6  ;;  %v889_v13 = vld [vmem:[#allocation2 + $0x40] sm:$0xff] (!%p1965_p10) }
 0x21a   : > { %868 = vst [vmem:[#allocation2 + $0x38] sm:$0xff] %v852_v23  ;;  %876 = vst [vmem:[#allocation2 + $0x78] sm:$0xff] %v860_v24  ;;  %v3341_v46 = vadd.f32 (!%p1965_p10), %v906_v42, %v884_v40  ;;  %v892_v7 = vld [vmem:[#allocation2 + $0x58] sm:$0xff] (!%p1965_p10)  ;;  %1258 = vmatpush1.bf16.msra.mxu1 (!%p1965_p10), %v2421_v2  ;;  %v891_v16 = vld [vmem:[#allocation2 + $0x50] sm:$0xff] (!%p1965_p10)  ;;  %v3371_v19 = vadd.f32 (!%p1965_p10), %v902_v53, %v889_v13 }
 0x21b   : > { %v925_v5 = vpack.c.bf16 %v3349_v63, %v3347_v62  ;;  %v3365_v12 = vadd.f32 %v906_v42, %v892_v7  ;;  %v3373_v20 = vadd.f32 %v902_v53, %v891_v16  ;;  %1259 = vmatprep.subr.bf16.mxu1 %v2422_v30  ;;  %v2433_v39 = vld [vmem:[#allocation9 + $0x60] ss:$8 sps:$4 sm:$0xff]   ;;  %v2434_v40 = vld [vmem:[#allocation9 + $0x74] ss:$8 sps:$4 sm:$0xff]  }
 0x21c   : > { %v926_v49 = vpack.c.bf16 %v3341_v46, %v3339_v45 }
 0x21d   : > { %v930_v15 = vpack.c.bf16 %v3365_v12, %v3363_v11  ;;  %v929_v23 = vpack.c.bf16 %v3373_v20, %v3371_v19 }
 0x21e   : > { %1100 = vmatprep.mubr.bf16.mxu0 %v926_v49  ;;  %v885_v3 = vld [vmem:[#allocation2 + $0x20] sm:$0xff]  ;;  %1260 = vmatpush1.bf16.msra.mxu1 %v2424_v31 }
 0x21f   : > { %v886_v54 = vld [vmem:[#allocation2 + $0x28] sm:$0xff]  ;;  %1101 = vmatmul.mubr.bf16.vlgmr.msra.gmra.mrb[0].mxu0 %v925_v5  ;;  %v3359_v9 = vadd.f32 %v902_v53, %v885_v3  ;;  %v893_v25 = vld [vmem:[#allocation2 + $0x60] sm:$0xff]  ;;  %1261 = vmatprep.subr.bf16.mxu1 %v2425_v32 }
 0x220   : > { %v3351_v0 = vadd.f32 %v906_v42, %v886_v54  ;;  %v887_v4 = vld [vmem:[#allocation2 + $0x30] sm:$0xff]  ;;  %v894_v17 = vld [vmem:[#allocation2 + $0x68] sm:$0xff]  ;;  %v3383_v27 = vadd.f32 %v902_v53, %v893_v25 }
 0x221   : > { %v888_v58 = vld [vmem:[#allocation2 + $0x38] sm:$0xff]  ;;  %v3361_v10 = vadd.f32 %v902_v53, %v887_v4  ;;  %v3375_v21 = vadd.f32 %v906_v42, %v894_v17  ;;  %v895_v26 = vld [vmem:[#allocation2 + $0x70] sm:$0xff] }
 0x222   : > { %v3353_v1 = vadd.f32 %v906_v42, %v888_v58  ;;  %v896_v18 = vld [vmem:[#allocation2 + $0x78] sm:$0xff]  ;;  %v3385_v28 = vadd.f32 %v902_v53, %v895_v26  ;;  %1262 = vmatpush1.bf16.msra.mxu1 %v2427_v34 }
 0x223   : > { %v927_v14 = vpack.c.bf16 %v3361_v10, %v3359_v9  ;;  %v3377_v22 = vadd.f32 %v906_v42, %v896_v18  ;;  %1263 = vmatprep.subr.bf16.mxu1 %v2428_v35  ;;  %v2864_v42 = vmov 0  }
 0x224   : > { %v928_v8 = vpack.c.bf16 %v3353_v1, %v3351_v0  ;;  %v931_v29 = vpack.c.bf16 %v3385_v28, %v3383_v27  ;;  %1285 = vmatprep.mubr.bf16.mxu1 %v2864_v42 }
 0x225   : > { %v932_v24 = vpack.c.bf16 %v3377_v22, %v3375_v21 }
 0x226   : > { %1108 = vmatprep.mubr.bf16.mxu0 %v928_v8  ;;  %1264 = vmatpush1.bf16.msra.mxu1 %v2430_v37 }
 0x227   : > { %1109 = vmatmul.mubr.bf16.gmra.mrb[4].mxu0 %v927_v14  ;;  %1265 = vmatprep.subr.bf16.mxu1 %v2431_v38 }
 0x228   : > { %1116 = vmatprep.mubr.bf16.mxu0 %v930_v15 }
 0x22a   : > { %1266 = vmatpush1.bf16.msra.mxu1 %v2433_v39 }
 0x22b   : > { %1267 = vmatprep.subr.bf16.mxu1 %v2434_v40 }
 0x22e   : > { %1268 = vmatpush1.bf16.msra.mxu1 %v2436_v41 }
 0x22f   : > { %1117 = vmatmul.mubr.bf16.gmra.mrb[8].mxu0 %v929_v23 }
 0x230   : > { %1124 = vmatprep.mubr.bf16.mxu0 %v932_v24 }
 0x237   : > { %1125 = vmatmul.mubr.bf16.gmra.mrb[12].mxu0 %v931_v29 }
 0x2f2   : > { %v2047_v44 = vpop.f32.mrb[0].mxu0 }
 0x2f3   : > { %v2048_v48 = vpop.f32.mrb[1].mxu0 }
 0x2f4   : > { %v2049_v49 = vadd.f32 %v2048_v48, %v2047_v44  ;;  %v2050_v50 = vpop.f32.mrb[2].mxu0  ;;  %v1161_v48 = vld [vmem:[%s3783_s19] sm:$0x3] }
 0x2f5   : > { %v2051_v51 = vpop.f32.mrb[3].mxu0 }
 0x2f6   : > { %v1103_v52 = vadd.f32 %v2049_v49, %v1966_v47  ;;  %v2052_v53 = vadd.f32 %v2051_v51, %v2050_v50  ;;  %v1166_v49 = vrot.slane %v1161_v48, %v901_v43 }
 0x2f8   : > { %v1106_v54 = vadd.f32 %v2052_v53, %v1966_v47  ;;  %2453 = vtanh.f32 %v1103_v52 }
 0x2fa   : > { %2455 = vtanh.f32 %v1106_v54  ;;  %v2053_v55 = vpop.f32.mrb[4].mxu0 }
 0x2fb   : > { %v2054_v56 = vpop.f32.mrb[5].mxu0 }
 0x2fc   : > { %v2055_v57 = vadd.f32 %v2054_v56, %v2053_v55  ;;  %v2056_v58 = vpop.f32.mrb[6].mxu0 }
 0x2fd   : > { %v2057_v59 = vpop.f32.mrb[7].mxu0 }
 0x2fe   : > { %v1111_v60 = vadd.f32 %v2055_v57, %v1966_v47  ;;  %v2058_v61 = vadd.f32 %v2057_v59, %v2056_v58 }
 0x300   : > { %v1114_v2 = vadd.f32 %v2058_v61, %v1966_v47  ;;  %2457 = vtanh.f32 %v1111_v60 }
 0x302   : > { %2459 = vtanh.f32 %v1114_v2  ;;  %v2059_v3 = vpop.f32.mrb[8].mxu0  ;;  %v2454_v4 = vpop.eup %2453 }
 0x303   : > { %v2060_v5 = vpop.f32.mrb[9].mxu0 }
 0x304   : > { %v2456_v6 = vpop.eup %2455  ;;  %v2061_v7 = vadd.f32 %v2060_v5, %v2059_v3  ;;  %v2062_v8 = vpop.f32.mrb[10].mxu0 }
 0x305   : > { %v2063_v13 = vpop.f32.mrb[11].mxu0  ;;  %v1141_v14 = vpack.c.bf16 %v2456_v6, %v2454_v4 }
 0x306   : > { %v1119_v15 = vadd.f32 %v2061_v7, %v1966_v47  ;;  %v2064_v16 = vadd.f32 %v2063_v13, %v2062_v8 }
 0x307   : > { %1286 = vmatmul.mubr.bf16.vlgmr.msra.gmra.mrb[0].mxu1 %v1141_v14 }
 0x308   : > { %v1122_v17 = vadd.f32 %v2064_v16, %v1966_v47  ;;  %1295 = vmatprep.mubr.bf16.mxu1 %v2864_v42  ;;  %2461 = vtanh.f32 %v1119_v15 }
 0x30a   : > { %2463 = vtanh.f32 %v1122_v17  ;;  %v2065_v18 = vpop.f32.mrb[12].mxu0  ;;  %v2458_v23 = vpop.eup %2457 }
 0x30b   : > { %v2066_v24 = vpop.f32.mrb[13].mxu0 }
 0x30c   : > { %v2460_v25 = vpop.eup %2459  ;;  %v2067_v26 = vadd.f32 %v2066_v24, %v2065_v18  ;;  %v2068_v29 = vpop.f32.mrb[14].mxu0 }
 0x30d   : > { %v2069_v30 = vpop.f32.mrb[15].mxu0  ;;  %v1142_v31 = vpack.c.bf16 %v2460_v25, %v2458_v23 }
 0x30e   : > { %v1127_v32 = vadd.f32 %v2067_v26, %v1966_v47  ;;  %v2070_v34 = vadd.f32 %v2069_v30, %v2068_v29 }
 0x30f   : > { %1296 = vmatmul.mubr.bf16.gmra.mrb[4].mxu1 %v1142_v31 }
 0x310   : > { %2465 = vtanh.f32 %v1127_v32  ;;  %v1130_v35 = vadd.f32 %v2070_v34, %v1966_v47  ;;  %1305 = vmatprep.mubr.bf16.mxu1 %v2864_v42  ;;  %v1170_v47 = vrot.slane %v1161_v48, %v905_v36  ;;  %v2442_v48 = vld [vmem:[#allocation11 + $0x10] sm:$0xff]  }
 0x312   : > { %2467 = vtanh.f32 %v1130_v35  ;;  %v2462_v37 = vpop.eup %2461 }
 0x314   : > { %v2464_v38 = vpop.eup %2463 }
 0x315   : > { %v1143_v39 = vpack.c.bf16 %v2464_v38, %v2462_v37  ;;  %v2437_v38 = vld [vmem:[#allocation11 + $0x40] sm:$0xff]  }
 0x316   : > { %2071 = vmatprep.subr.bf16.mxu0 %v2437_v38  ;;  %2143 = vmatprep.subr.bf16.mxu1 %v2437_v38 }
 0x317   : > { %1306 = vmatmul.mubr.bf16.gmra.mrb[8].mxu1 %v1143_v39  ;;  %v2438_v39 = vld [vmem:[#allocation11] sm:$0xff]  }
 0x318   : > { %1315 = vmatprep.mubr.bf16.mxu1 %v2864_v42  ;;  %2072 = vmatpush3.bf16.msra.mxu0 %v2438_v39 }
 0x319   : > { %2151 = vmatpush3.bf16.msra.mxu1 %v2438_v39 }
 0x31a   : > { %v2466_v40 = vpop.eup %2465 }
 0x31c   : > { %v2468_v41 = vpop.eup %2467 }
 0x31d   : > { %v1144_v44 = vpack.c.bf16 %v2468_v41, %v2466_v40  ;;  %v2439_v40 = vld [vmem:[#allocation11 + $0x48] sm:$0xff]  }
 0x31e   : > { %v2440_v41 = vld [vmem:[#allocation11 + $0x8] sm:$0xff]   ;;  %2073 = vmatprep.subr.bf16.mxu0 %v2439_v40  ;;  %2144 = vmatprep.subr.bf16.mxu1 %v2439_v40 }
 0x31f   : > { %1316 = vmatmul.mubr.bf16.gmra.mrb[12].mxu1 %v1144_v44  ;;  %v2441_v44 = vld [vmem:[#allocation11 + $0x50] sm:$0xff]   ;;  %2074 = vmatpush3.bf16.msra.mxu0 %v2440_v41 }
 0x320   : > { %2152 = vmatpush3.bf16.msra.mxu1 %v2440_v41  ;;  %2075 = vmatprep.subr.bf16.mxu0 %v2441_v44 }
 0x321   : > { %2145 = vmatprep.subr.bf16.mxu1 %v2441_v44 }
 0x323   : > { %2076 = vmatpush3.bf16.msra.mxu0 %v2442_v48 }
 0x324   : > { %2153 = vmatpush3.bf16.msra.mxu1 %v2442_v48 }
 0x3da   : > { %v1287_v50 = vpop.f32.mrb[0].mxu1 }
 0x3db   : > { %v3399_v51 = vadd.f32 %v1287_v50, %v1166_v49  ;;  %v1289_v52 = vpop.f32.mrb[1].mxu1 }
 0x3dc   : > { %v3401_v53 = vadd.f32 %v1289_v52, %v1170_v47  ;;  %v1291_v42 = vpop.f32.mrb[2].mxu1 }
 0x3dd   : > { %v1293_v54 = vpop.f32.mrb[3].mxu1  ;;  %v3403_v55 = vadd.f32 %v1291_v42, %v1166_v49 }
 0x3de   : > { %v3405_v56 = vadd.f32 %v1293_v54, %v1170_v47  ;;  %v1326_v57 = vmax.f32 %v3399_v51, %v3401_v53 }
 0x3e0   : > { %1327 = vmax.xlane.f32.xlu0 %v1326_v57  ;;  %v1329_v33 = vmax.f32 %v3403_v55, %v3405_v56 }
 0x3e2   : > { %v1297_v43 = vpop.f32.mrb[4].mxu1 }
 0x3e3   : > { %v3411_v36 = vadd.f32 %v1297_v43, %v1166_v49  ;;  %v1299_v58 = vpop.f32.mrb[5].mxu1 }
 0x3e4   : > { %v3413_v59 = vadd.f32 %v1299_v58, %v1170_v47  ;;  %v1301_v60 = vpop.f32.mrb[6].mxu1  ;;  %1330 = vmax.xlane.f32.xlu0 %v1329_v33 }
 0x3e5   : > { %v1303_v61 = vpop.f32.mrb[7].mxu1  ;;  %v3427_v16 = vadd.f32 %v1301_v60, %v1166_v49 }
 0x3e6   : > { %v1332_v2 = vmax.f32 %v3411_v36, %v3413_v59  ;;  %v3429_v17 = vadd.f32 %v1303_v61, %v1170_v47 }
 0x3e8   : > { %1333 = vmax.xlane.f32.xlu0 %v1332_v2  ;;  %v1335_v34 = vmax.f32 %v3427_v16, %v3429_v17 }
 0x3ea   : > { %v1307_v3 = vpop.f32.mrb[8].mxu1 }
 0x3eb   : > { %v3417_v4 = vadd.f32 %v1307_v3, %v1166_v49  ;;  %v1309_v5 = vpop.f32.mrb[9].mxu1 }
 0x3ec   : > { %v3419_v6 = vadd.f32 %v1309_v5, %v1170_v47  ;;  %v1311_v7 = vpop.f32.mrb[10].mxu1 }
 0x3ed   : > { %v1313_v8 = vpop.f32.mrb[11].mxu1  ;;  %v3421_v13 = vadd.f32 %v1311_v7, %v1166_v49 }
 0x3ee   : > { %v3423_v14 = vadd.f32 %v1313_v8, %v1170_v47  ;;  %v1338_v15 = vmax.f32 %v3417_v4, %v3419_v6 }
 0x3f0   : > { %1339 = vmax.xlane.f32.xlu1 %v1338_v15  ;;  %v1341_v23 = vmax.f32 %v3421_v13, %v3423_v14 }
 0x3f2   : > { %v1317_v18 = vpop.f32.mrb[12].mxu1 }
 0x3f3   : > { %v3433_v24 = vadd.f32 %v1317_v18, %v1166_v49  ;;  %v1319_v25 = vpop.f32.mrb[13].mxu1 }
 0x3f4   : > { %v3435_v26 = vadd.f32 %v1319_v25, %v1170_v47  ;;  %v1321_v29 = vpop.f32.mrb[14].mxu1  ;;  %1342 = vmax.xlane.f32.xlu1 %v1341_v23 }
 0x3f5   : > { %v1323_v30 = vpop.f32.mrb[15].mxu1  ;;  %v3437_v31 = vadd.f32 %v1321_v29, %v1166_v49 }
 0x3f6   : > { %v3439_v32 = vadd.f32 %v1323_v30, %v1170_v47  ;;  %v1344_v35 = vmax.f32 %v3433_v24, %v3435_v26 }
 0x3f8   : > { %1336 = vmax.xlane.f32.xlu1 %v1335_v34  ;;  %1345 = vmax.xlane.f32.xlu0 %v1344_v35  ;;  %v1347_v37 = vmax.f32 %v3437_v31, %v3439_v32 }
 0x3fc   : > { %1348 = vmax.xlane.f32.xlu1 %v1347_v37 }
 0x46d   : > { %v1328_v49 = vpop.xlane.xlu0 %1327 }
 0x46e   : > { %v1350_v47 = vsub.f32 %v3399_v51, %v1328_v49  ;;  %v1351_v50 = vsub.f32 %v3401_v53, %v1328_v49 }
 0x470   : > { %v1366_v52 = vmul.f32 1.442695, %v1350_v47  ;;  %v1368_v42 = vmul.f32 1.442695, %v1351_v50 }
 0x471   : > { %v1331_v54 = vpop.xlane.xlu0 %1330 }
 0x472   : > { %2469 = vpow2.f32 %v1366_v52  ;;  %v1352_v57 = vsub.f32 %v3403_v55, %v1331_v54  ;;  %v1353_v43 = vsub.f32 %v3405_v56, %v1331_v54 }
 0x473   : > { %2471 = vpow2.f32 %v1368_v42 }
 0x474   : > { %v1370_v33 = vmul.f32 1.442695, %v1352_v57  ;;  %v1372_v58 = vmul.f32 1.442695, %v1353_v43  ;;  %v2444_v57 = vld [vmem:[#allocation11 + $0x18] sm:$0xff]  }
 0x475   : > { %v1334_v60 = vpop.xlane.xlu0 %1333 }
 0x476   : > { %2473 = vpow2.f32 %v1370_v33  ;;  %v1354_v51 = vsub.f32 %v3411_v36, %v1334_v60  ;;  %v1355_v53 = vsub.f32 %v3413_v59, %v1334_v60  ;;  %v2445_v60 = vld [vmem:[#allocation11 + $0x60] sm:$0xff]  }
 0x477   : > { %2475 = vpow2.f32 %v1372_v58 }
 0x478   : > { %v1374_v8 = vmul.f32 1.442695, %v1354_v51  ;;  %v1376_v36 = vmul.f32 1.442695, %v1355_v53  ;;  %v2446_v53 = vld [vmem:[#allocation11 + $0x20] sm:$0xff]  }
 0x47c   : > { %v3451_v61 = vpop.eup %2469 }
 0x47d   : > { %v3454_v2 = vpop.eup %2471  ;;  %v1340_v3 = vpop.xlane.xlu1 %1339 }
 0x47e   : > { %v1358_v5 = vsub.f32 %v3417_v4, %v1340_v3  ;;  %v1359_v55 = vsub.f32 %v3419_v6, %v1340_v3  ;;  %v1398_v56 = vadd.f32 %v3454_v2, %v3451_v61 }
 0x480   : > { %v3461_v7 = vpop.eup %2473  ;;  %v1382_v15 = vmul.f32 1.442695, %v1358_v5  ;;  %v1384_v18 = vmul.f32 1.442695, %v1359_v55  ;;  %1399 = vadd.xlane.f32.xlu0 %v1398_v56 }
 0x481   : > { %v3463_v23 = vpop.eup %2475  ;;  %v1343_v25 = vpop.xlane.xlu1 %1342 }
 0x482   : > { %2477 = vpow2.f32 %v1382_v15  ;;  %v1360_v59 = vsub.f32 %v3421_v13, %v1343_v25  ;;  %v1361_v4 = vsub.f32 %v3423_v14, %v1343_v25  ;;  %v1401_v6 = vadd.f32 %v3463_v23, %v3461_v7  ;;  %v2447_v15 = vld [vmem:[#allocation11 + $0x68] sm:$0xff]  }
 0x483   : > { %2479 = vpow2.f32 %v1384_v18 }
 0x484   : > { %2481 = vpow2.f32 %v1374_v8  ;;  %v1386_v29 = vmul.f32 1.442695, %v1360_v59  ;;  %v1388_v30 = vmul.f32 1.442695, %v1361_v4  ;;  %1402 = vadd.xlane.f32.xlu1 %v1401_v6  ;;  %v2449_v59 = vld [vmem:[#allocation11 + $0x70] sm:$0xff]   ;;  %v2451_v6 = vld [vmem:[#allocation11 + $0x78] sm:$0xff]  }
 0x485   : > { %2483 = vpow2.f32 %v1376_v36  ;;  %v1337_v34 = vpop.xlane.xlu1 %1336  ;;  %v1346_v35 = vpop.xlane.xlu0 %1345  ;;  %v2448_v36 = vld [vmem:[#allocation11 + $0x28] sm:$0xff]   ;;  %v2450_v4 = vld [vmem:[#allocation11 + $0x30] sm:$0xff]  }
 0x486   : > { %2485 = vpow2.f32 %v1386_v29  ;;  %v1356_v37 = vsub.f32 %v3427_v16, %v1337_v34  ;;  %v1357_v38 = vsub.f32 %v3429_v17, %v1337_v34  ;;  %v1362_v13 = vsub.f32 %v3433_v24, %v1346_v35  ;;  %v2452_v29 = vld [vmem:[#allocation11 + $0x38] sm:$0xff]  }
 0x487   : > { %2487 = vpow2.f32 %v1388_v30  ;;  %v1363_v14 = vsub.f32 %v3435_v26, %v1346_v35 }
 0x488   : > { %v1378_v39 = vmul.f32 1.442695, %v1356_v37  ;;  %v1380_v40 = vmul.f32 1.442695, %v1357_v38  ;;  %v1390_v41 = vmul.f32 1.442695, %v1362_v13 }
 0x489   : > { %v1392_v44 = vmul.f32 1.442695, %v1363_v14  ;;  %v1349_v48 = vpop.xlane.xlu1 %1348 }
 0x48a   : > { %2489 = vpow2.f32 %v1378_v39  ;;  %v1364_v49 = vsub.f32 %v3437_v31, %v1349_v48  ;;  %v1365_v47 = vsub.f32 %v3439_v32, %v1349_v48  ;;  %v2443_v32 = vld [vmem:[#allocation11 + $0x58] sm:$0xff]  }
 0x48b   : > { %2491 = vpow2.f32 %v1380_v40  ;;  %2077 = vmatprep.subr.bf16.mxu0 %v2443_v32  ;;  %2146 = vmatprep.subr.bf16.mxu1 %v2443_v32 }
 0x48c   : > { %v3475_v50 = vpop.eup %2477  ;;  %2493 = vpow2.f32 %v1390_v41  ;;  %v1394_v16 = vmul.f32 1.442695, %v1364_v49  ;;  %v1396_v17 = vmul.f32 1.442695, %v1365_v47  ;;  %2078 = vmatpush3.bf16.msra.mxu0 %v2444_v57  ;;  %2154 = vmatpush3.bf16.msra.mxu1 %v2444_v57 }
 0x48d   : > { %v3477_v24 = vpop.eup %2479  ;;  %2495 = vpow2.f32 %v1392_v44  ;;  %2079 = vmatprep.subr.bf16.mxu0 %v2445_v60  ;;  %2147 = vmatprep.subr.bf16.mxu1 %v2445_v60 }
 0x48e   : > { %v3479_v26 = vpop.eup %2481  ;;  %2497 = vpow2.f32 %v1394_v16  ;;  %v1410_v52 = vadd.f32 %v3477_v24, %v3475_v50 }
 0x48f   : > { %v3483_v42 = vpop.eup %2483  ;;  %2499 = vpow2.f32 %v1396_v17 }
 0x490   : > { %v3485_v31 = vpop.eup %2485  ;;  %1411 = vadd.xlane.f32.xlu0 %v1410_v52  ;;  %v1404_v33 = vadd.f32 %v3483_v42, %v3479_v26  ;;  %2080 = vmatpush3.bf16.msra.mxu0 %v2446_v53 }
 0x491   : > { %v3487_v54 = vpop.eup %2487  ;;  %2155 = vmatpush3.bf16.msra.mxu1 %v2446_v53  ;;  %2081 = vmatprep.subr.bf16.mxu0 %v2447_v15 }
 0x492   : > { %v1413_v43 = vadd.f32 %v3487_v54, %v3485_v31  ;;  %2148 = vmatprep.subr.bf16.mxu1 %v2447_v15 }
 0x494   : > { %v3493_v58 = vpop.eup %2489  ;;  %1414 = vadd.xlane.f32.xlu1 %v1413_v43  ;;  %1405 = vadd.xlane.f32.xlu0 %v1404_v33 }
 0x495   : > { %v3495_v51 = vpop.eup %2491  ;;  %2082 = vmatpush3.bf16.msra.mxu0 %v2448_v36  ;;  %2156 = vmatpush3.bf16.msra.mxu1 %v2448_v36 }
 0x496   : > { %v3497_v3 = vpop.eup %2493  ;;  %v1407_v5 = vadd.f32 %v3495_v51, %v3493_v58  ;;  %2083 = vmatprep.subr.bf16.mxu0 %v2449_v59  ;;  %2149 = vmatprep.subr.bf16.mxu1 %v2449_v59 }
 0x497   : > { %v3501_v55 = vpop.eup %2495 }
 0x498   : > { %v3503_v56 = vpop.eup %2497  ;;  %1408 = vadd.xlane.f32.xlu1 %v1407_v5  ;;  %v1416_v8 = vadd.f32 %v3501_v55, %v3497_v3 }
 0x499   : > { %v3507_v18 = vpop.eup %2499  ;;  %2084 = vmatpush3.bf16.msra.mxu0 %v2450_v4  ;;  %2157 = vmatpush3.bf16.msra.mxu1 %v2450_v4 }
 0x49a   : > { %1417 = vadd.xlane.f32.xlu0 %v1416_v8  ;;  %v1419_v25 = vadd.f32 %v3507_v18, %v3503_v56  ;;  %2085 = vmatprep.subr.bf16.mxu0 %v2451_v6 }
 0x49b   : > { %2150 = vmatprep.subr.bf16.mxu1 %v2451_v6 }
 0x49c   : > { %1420 = vadd.xlane.f32.xlu1 %v1419_v25 }
 0x49d   : > { %2086 = vmatpush3.bf16.msra.mxu0 %v2452_v29  ;;  %2158 = vmatpush3.bf16.msra.mxu1 %v2452_v29 }
 0x50d   : > { %v1400_v30 = vpop.xlane.xlu0 %1399 }
 0x50e   : > { %2501 = vrcp.f32 %v1400_v30 }
 0x511   : > { %v1403_v34 = vpop.xlane.xlu1 %1402 }
 0x512   : > { %2503 = vrcp.f32 %v1403_v34 }
 0x518   : > { %v2502_v35 = vpop.eup %2501 }
 0x519   : > { %v1430_v37 = vmul.f32 %v2502_v35, %v3451_v61  ;;  %v1431_v38 = vmul.f32 %v2502_v35, %v3454_v2 }
 0x51b   : > { %1446 = vst [vmem:[%s3286_s12] sm:$0xff] %v1430_v37  ;;  %1447 = vst [vmem:[%s3286_s12 + $0x8] sm:$0xff] %v1431_v38  ;;  %v1462_v41 = vmul.f32 %v1430_v37, %v3347_v62  ;;  %v1463_v48 = vmul.f32 %v1431_v38, %v3339_v45 }
 0x51c   : > { %v2504_v13 = vpop.eup %2503 }
 0x51d   : > { %v1432_v14 = vmul.f32 %v2504_v13, %v3461_v7  ;;  %v1412_v39 = vpop.xlane.xlu0 %1411  ;;  %v1433_v40 = vmul.f32 %v2504_v13, %v3463_v23 }
 0x51e   : > { %2505 = vrcp.f32 %v1412_v39 }
 0x51f   : > { %1448 = vst [vmem:[%s3286_s12 + $0x10] sm:$0xff] %v1432_v14  ;;  %v1464_v44 = vmul.f32 %v1432_v14, %v3349_v63  ;;  %1449 = vst [vmem:[%s3286_s12 + $0x18] sm:$0xff] %v1433_v40  ;;  %v1465_v61 = vmul.f32 %v1433_v40, %v3341_v46 }
 0x521   : > { %v1415_v2 = vpop.xlane.xlu1 %1414  ;;  %v1406_v49 = vpop.xlane.xlu0 %1405  ;;  %v1479_v47 = vpack.c.bf16 %v1465_v61, %v1463_v48  ;;  %v1478_v7 = vpack.c.bf16 %v1464_v44, %v1462_v41 }
 0x522   : > { %2507 = vrcp.f32 %v1415_v2 }
 0x523   : > { %2509 = vrcp.f32 %v1406_v49  ;;  %1653 = vmatprep.mubr.bf16.mxu0 %v1479_v47 }
 0x524   : > { %1654 = vmatmul.mubr.bf16.vlgmr.msra.gmra.mrb[16].mxu0 %v1478_v7 }
 0x525   : > { %v1409_v23 = vpop.xlane.xlu1 %1408 }
 0x526   : > { %2511 = vrcp.f32 %v1409_v23 }
 0x527   : > { %v1418_v62 = vpop.xlane.xlu0 %1417 }
 0x528   : > { %v2506_v63 = vpop.eup %2505  ;;  %2513 = vrcp.f32 %v1418_v62 }
 0x529   : > { %v1438_v45 = vmul.f32 %v2506_v63, %v3475_v50  ;;  %v1421_v46 = vpop.xlane.xlu1 %1420  ;;  %v1439_v16 = vmul.f32 %v2506_v63, %v3477_v24 }
 0x52a   : > { %2515 = vrcp.f32 %v1421_v46 }
 0x52b   : > { %1454 = vst [vmem:[%s3286_s12 + $0x40] sm:$0xff] %v1438_v45  ;;  %1455 = vst [vmem:[%s3286_s12 + $0x48] sm:$0xff] %v1439_v16  ;;  %v1470_v50 = vmul.f32 %v1438_v45, %v3371_v19  ;;  %v1471_v60 = vmul.f32 %v1439_v16, %v3363_v11 }
 0x52c   : > { %v2508_v17 = vpop.eup %2507 }
 0x52d   : > { %v2510_v52 = vpop.eup %2509  ;;  %v1440_v32 = vmul.f32 %v2508_v17, %v3485_v31  ;;  %v1441_v57 = vmul.f32 %v2508_v17, %v3487_v54 }
 0x52e   : > { %v1435_v43 = vmul.f32 %v2510_v52, %v3483_v42  ;;  %v1434_v33 = vmul.f32 %v2510_v52, %v3479_v26 }
 0x52f   : > { %1456 = vst [vmem:[%s3286_s12 + $0x50] sm:$0xff] %v1440_v32  ;;  %v1472_v24 = vmul.f32 %v1440_v32, %v3373_v20  ;;  %1457 = vst [vmem:[%s3286_s12 + $0x58] sm:$0xff] %v1441_v57  ;;  %v1473_v53 = vmul.f32 %v1441_v57, %v3365_v12 }
 0x530   : > { %v2512_v5 = vpop.eup %2511  ;;  %1451 = vst [vmem:[%s3286_s12 + $0x28] sm:$0xff] %v1435_v43  ;;  %1450 = vst [vmem:[%s3286_s12 + $0x20] sm:$0xff] %v1434_v33  ;;  %v1467_v20 = vmul.f32 %v1435_v43, %v3351_v0  ;;  %v1466_v8 = vmul.f32 %v1434_v33, %v3359_v9 }
 0x531   : > { %v1483_v31 = vpack.c.bf16 %v1473_v53, %v1471_v60  ;;  %v1482_v54 = vpack.c.bf16 %v1472_v24, %v1470_v50  ;;  %v1437_v42 = vmul.f32 %v2512_v5, %v3495_v51  ;;  %v1436_v26 = vmul.f32 %v2512_v5, %v3493_v58 }
 0x532   : > { %v2514_v19 = vpop.eup %2513 }
 0x533   : > { %1669 = vmatprep.mubr.bf16.mxu1 %v1483_v31  ;;  %1453 = vst [vmem:[%s3286_s12 + $0x38] sm:$0xff] %v1437_v42  ;;  %v1469_v11 = vmul.f32 %v1437_v42, %v3353_v1  ;;  %1452 = vst [vmem:[%s3286_s12 + $0x30] sm:$0xff] %v1436_v26  ;;  %v1468_v12 = vmul.f32 %v1436_v26, %v3361_v10  ;;  %v1443_v51 = vmul.f32 %v2514_v19, %v3501_v55 }
 0x534   : > { %v1442_v58 = vmul.f32 %v2514_v19, %v3497_v3  ;;  %v2516_v15 = vpop.eup %2515  ;;  %1670 = vmatmul.mubr.bf16.vlgmr.msra.gmra.mrb[16].mxu1 %v1482_v54 }
 0x535   : > { %v1481_v36 = vpack.c.bf16 %v1469_v11, %v1467_v20  ;;  %v1480_v25 = vpack.c.bf16 %v1468_v12, %v1466_v8  ;;  %v1445_v0 = vmul.f32 %v2516_v15, %v3507_v18  ;;  %1459 = vst [vmem:[%s3286_s12 + $0x68] sm:$0xff] %v1443_v51  ;;  %v1444_v9 = vmul.f32 %v2516_v15, %v3503_v56  ;;  %v1999_v56 = vld [vmem:[%s3784_s22] ss:$0 sm:$0xff] }
 0x536   : > { %1458 = vst [vmem:[%s3286_s12 + $0x60] sm:$0xff] %v1442_v58  ;;  %v1475_v1 = vmul.f32 %v1443_v51, %v3375_v21  ;;  %v1474_v3 = vmul.f32 %v1442_v58, %v3383_v27 }
 0x537   : > { %1661 = vmatprep.mubr.bf16.mxu0 %v1481_v36  ;;  %1461 = vst [vmem:[%s3286_s12 + $0x78] sm:$0xff] %v1445_v0  ;;  %v1477_v10 = vmul.f32 %v1445_v0, %v3377_v22  ;;  %1460 = vst [vmem:[%s3286_s12 + $0x70] sm:$0xff] %v1444_v9  ;;  %v1476_v55 = vmul.f32 %v1444_v9, %v3385_v28 }
 0x538   : > { %1662 = vmatmul.mubr.bf16.gmra.mrb[20].mxu0 %v1480_v25 }
 0x539   : > { %v1485_v59 = vpack.c.bf16 %v1477_v10, %v1475_v1  ;;  %v1484_v18 = vpack.c.bf16 %v1476_v55, %v1474_v3 }
 0x53b   : > { %1677 = vmatprep.mubr.bf16.mxu1 %v1485_v59 }
 0x53c   : > { %1678 = vmatmul.mubr.bf16.gmra.mrb[20].mxu1 %v1484_v18 }
 0x5f7   : > { %v2087_v4 = vpop.f32.mrb[16].mxu0 }
 0x5f8   : > { %v2088_v21 = vpop.f32.mrb[17].mxu0 }
 0x5f9   : > { %v2089_v6 = vadd.f32 %v2088_v21, %v2087_v4  ;;  %v2090_v22 = vpop.f32.mrb[18].mxu0 }
 0x5fa   : > { %v2091_v29 = vpop.f32.mrb[19].mxu0 }
 0x5fb   : > { %v1656_v30 = vadd.f32 %v2089_v6, %v1999_v56  ;;  %v2092_v34 = vadd.f32 %v2091_v29, %v2090_v22 }
 0x5fd   : > { %1686 = vst [vmem:[%s3284_s16] sm:$0xff] %v1656_v30  ;;  %v1659_v27 = vadd.f32 %v2092_v34, %v1999_v56 }
 0x5ff   : > { %1687 = vst [vmem:[%s3284_s16 + $0x8] sm:$0xff] %v1659_v27 }
 0x607   : > { %v2099_v28 = vpop.f32.mrb[16].mxu1 }
 0x608   : > { %v2100_v35 = vpop.f32.mrb[17].mxu1 }
 0x609   : > { %v2101_v37 = vadd.f32 %v2100_v35, %v2099_v28  ;;  %v2102_v38 = vpop.f32.mrb[18].mxu1 }
 0x60a   : > { %v2103_v13 = vpop.f32.mrb[19].mxu1 }
 0x60b   : > { %v1672_v14 = vadd.f32 %v2101_v37, %v1999_v56  ;;  %v2104_v39 = vadd.f32 %v2103_v13, %v2102_v38  ;;  %v2093_v40 = vpop.f32.mrb[20].mxu0 }
 0x60c   : > { %v2094_v41 = vpop.f32.mrb[21].mxu0 }
 0x60d   : > { %1690 = vst [vmem:[%s3284_s16 + $0x20] sm:$0xff] %v1672_v14  ;;  %v1675_v44 = vadd.f32 %v2104_v39, %v1999_v56  ;;  %v2095_v48 = vadd.f32 %v2094_v41, %v2093_v40  ;;  %v2096_v61 = vpop.f32.mrb[22].mxu0 }
 0x60e   : > { %v2097_v2 = vpop.f32.mrb[23].mxu0 }
 0x60f   : > { %1691 = vst [vmem:[%s3284_s16 + $0x28] sm:$0xff] %v1675_v44  ;;  %v1664_v49 = vadd.f32 %v2095_v48, %v1999_v56  ;;  %v2098_v47 = vadd.f32 %v2097_v2, %v2096_v61  ;;  %v2105_v7 = vpop.f32.mrb[20].mxu1 }
 0x610   : > { %v2106_v23 = vpop.f32.mrb[21].mxu1 }
 0x611   : > { %1688 = vst [vmem:[%s3284_s16 + $0x10] sm:$0xff] %v1664_v49  ;;  %v1667_v62 = vadd.f32 %v2098_v47, %v1999_v56  ;;  %v2107_v63 = vadd.f32 %v2106_v23, %v2105_v7  ;;  %v2108_v45 = vpop.f32.mrb[22].mxu1 }
 0x612   : > { %v2109_v46 = vpop.f32.mrb[23].mxu1 }
 0x613   : > { %1689 = vst [vmem:[%s3284_s16 + $0x18] sm:$0xff] %v1667_v62  ;;  %v1680_v16 = vadd.f32 %v2107_v63, %v1999_v56  ;;  %v2110_v17 = vadd.f32 %v2109_v46, %v2108_v45 }
 0x615   : > { %1692 = vst [vmem:[%s3284_s16 + $0x30] sm:$0xff] %v1680_v16  ;;  %v1683_v52 = vadd.f32 %v2110_v17, %v1999_v56 }
 0x617   : > { %1693 = vst [vmem:[%s3284_s16 + $0x38] sm:$0xff] %v1683_v52 }
 0x618 PF: > { %s3785_s27 = sld [smem:[#allocation24_spill]]  ;;  %s3786_s5 = sld [smem:[#allocation27_spill]] }
 0x619   : > { %s3787_s28 = sld [smem:[#allocation40_spill]]  ;;  %s1713_s23 = sshll.u32 %s3284_s16, 4  ;;  %s3577_s23 = int_to_ptr.vmem [resolvable:$true] %s1713_s23 }
 0x61a   : > { %s1695_s13 = scalar_lea.sflag [#allocation5], %s3280_s29  ;;  %s2661_s8 = scalar_lea.vmem %s3577_s23, 1024 }
 0x61b   : > { %p2662_p7 = scmp.ne.s32.totalorder %s3577_s23, %s2661_s8  ;;  %s2865_s2 = smov [#allocation12]  }
 0x61c   : > { %s2665_s19 = sshll.u32 %s2865_s2, 4  ;;  %s2666_s19 = int_to_ptr.vmem [resolvable:$false] %s2665_s19 }
 0x61d   : > { %s2667_s10 = scalar_lea.vmem %s2666_s19, 2048  ;;  %p2668_p12 = scmp.lt.s32.totalorder %s3577_s23, %s2666_s19 }
 0x61e   : > { %s2028_s9 = sshll.u32 %s3785_s27, 10  ;;  %p3788_p0 = scmp.ne.s32.totalorder %s3786_s5, 0 }
 0x61f   : > { %s3574_s4 = scalar_lea.hbm %s3787_s28, %s2028_s9  ;;  %p2669_p9 = scmp.lt.s32.totalorder %s2667_s10, %s2661_s8 }
 0x620   : > { %p2663_p13 = pnand %p2662_p7, %p3788_p0 }
 0x621   : > { %p2670_p4 = por %p2669_p9, %p2668_p12 }
 0x622   : > { %p2664_p8 = pneg %p2663_p13 }
 0x624   : > { %p2671_p5 = pnand %p2670_p4, %p2664_p8 }
 0x626   : > { %2674 = shalt.err (!%p2671_p5)
}
 0x627   : > { %s2675_s16 = scalar_lea.hbm %s3574_s4, 1024  ;;  %s2679_s9 = scalar_lea.hbm %s3787_s28, 2048 }
 0x628   : > { %p2676_p6 = scmp.ne.s32.totalorder %s3574_s4, %s2675_s16  ;;  %p2680_p2 = scmp.lt.u32.totalorder %s3574_s4, %s3787_s28 }
 0x629   : > { %p2681_p11 = scmp.lt.u32.totalorder %s2679_s9, %s2675_s16  ;;  %p2683_p7 = scmp.lt.u32.totalorder %s2675_s16, %s3574_s4 }
 0x62a   : > { %p2677_p1 = pnand %p2676_p6, %p3788_p0 }
 0x62b   : > { %p2682_p10 = por %p2681_p11, %p2680_p2 }
 0x62c   : > { %p2678_p3 = pneg %p2677_p1 }
 0x62d   : > { %p2684_p13 = por %p2683_p7, %p2682_p10 }
 0x62f   : > { %p2685_p8 = pnand %p2684_p13, %p2678_p3 }
 0x631   : > { %2688 = shalt.err (!%p2685_p8)
}
 0x632   : > { %s2866_s8 = smov 128   ;;  %s2867_s2 = smov 8  }
 0x633   : > { %2175 = dma.vmem_to_hbm [thread:$0]  (%p3788_p0), %s3577_s23, 1024, %s3574_s4, %s1695_s13, %s2866_s8, %s2866_s8, %s2867_s2  }
 0x634   : > { %s2030_s19 = sshll.u32 %s3785_s27, 11  ;;  %s1730_s10 = sshll.u32 %s3286_s12, 4  ;;  %s3610_s10 = int_to_ptr.vmem [resolvable:$true] %s1730_s10 }
 0x635   : > { %s3789_s22 = sld [smem:[#allocation41_spill]]  ;;  %s1700_s7 = scalar_lea.sflag [#allocation14], %s3280_s29 }
 0x636   : > { %s2689_s0 = scalar_lea.vmem %s3610_s10, 2048  ;;  %s2868_s1 = smov [#allocation13]  }
 0x637   : > { %p2690_p12 = scmp.ne.s32.totalorder %s3610_s10, %s2689_s0  ;;  %s2693_s4 = sshll.u32 %s2868_s1, 4  ;;  %s2694_s4 = int_to_ptr.vmem [resolvable:$false] %s2693_s4 }
 0x638   : > { %s2695_s12 = scalar_lea.vmem %s2694_s4, 4096  ;;  %p2696_p5 = scmp.lt.s32.totalorder %s3610_s10, %s2694_s4 }
 0x639   : > { %p2691_p9 = pnand %p2690_p12, %p3788_p0  ;;  %p2697_p6 = scmp.lt.s32.totalorder %s2695_s12, %s2689_s0 }
 0x63b   : > { %s3790_s9 = smov %s3789_s22  ;;  %s3608_s6 = scalar_lea.hbm %s3789_s22, %s2030_s19 }
 0x63c   : > { %p2692_p4 = pneg %p2691_p9  ;;  %p2698_p1 = por %p2697_p6, %p2696_p5 }
 0x63e   : > { %p2699_p3 = pnand %p2698_p1, %p2692_p4 }
 0x640   : > { %2702 = shalt.err (!%p2699_p3)
}
 0x641   : > { %s2703_s27 = scalar_lea.hbm %s3608_s6, 2048  ;;  %s2707_s1 = scalar_lea.hbm %s3790_s9, 4096 }
 0x642   : > { %p2704_p2 = scmp.ne.s32.totalorder %s3608_s6, %s2703_s27  ;;  %p2708_p7 = scmp.lt.u32.totalorder %s3608_s6, %s3790_s9 }
 0x643   : > { %p2709_p13 = scmp.lt.u32.totalorder %s2707_s1, %s2703_s27  ;;  %p2711_p12 = scmp.lt.u32.totalorder %s2703_s27, %s3608_s6 }
 0x644   : > { %p2705_p11 = pnand %p2704_p2, %p3788_p0 }
 0x645   : > { %p2710_p8 = por %p2709_p13, %p2708_p7 }
 0x646   : > { %p2706_p10 = pneg %p2705_p11 }
 0x647   : > { %p2712_p9 = por %p2711_p12, %p2710_p8 }
 0x649   : > { %p2713_p4 = pnand %p2712_p9, %p2706_p10 }
 0x64b   : > { %2716 = shalt.err (!%p2713_p4)
}
 0x64c   : > { %s2869_s0 = smov 256   ;;  %s2870_s19 = smov 16  }
 0x64d   : > { %2176 = dma.vmem_to_hbm [thread:$0]  (%p3788_p0), %s3610_s10, 2048, %s3608_s6, %s1700_s7, %s2869_s0, %s2869_s0, %s2870_s19  }
 0x64e PF: > { %s3791_s30 = sld [smem:[#allocation21_spill]]  ;;  %s3792_s16 = sld [smem:[#allocation28_spill]] }
 0x64f   : > { %p2210_p5 = scmp.ge.s32.totalorder %s2851_s26, 2 }
 0x654   : > { %s1745_s22 = sand.u32 1, %s3791_s30   ;;  %p3793_p6 = scmp.ne.s32.totalorder %s3792_s16, 0 }
 0x655   : > { %s1746_s4 = scalar_lea.sflag [#allocation5], %s1745_s22 }
 0x656   : > { %p2197_p1 = pnand %p2210_p5, %p3793_p6 }
 0x658   : > { %2790 = dma.done.wait (!%p2197_p1), %s1746_s4, 1024  }
 0x659   : > { %2792 = vsyncadd (!%p2197_p1), %s1746_s4, 4294966272  ;;  %s1755_s12 = scalar_lea.sflag [#allocation14], %s1745_s22 }
 0x65a   : > { %2794 = dma.done.wait (!%p2197_p1), %s1755_s12, 2048  }
 0x65b   : > { %2796 = vsyncadd (!%p2197_p1), %s1755_s12, 4294965248  ;;  %s34_s26 = sadd.s32 1, %s2851_s26   ;;  %s3795_s13 = sld [smem:[#allocation22_spill]] }
 0x65c   : > { %p3641_p3 = scmp.ge.s32.totalorder %s34_s26, 6   ;;  %s3796_s29 = smov %s3146_s14 }
 0x65d   : > { %s3797_s10 = sld [smem:[#allocation29_spill]]  ;;  %s3798_s6 = sld [smem:[#allocation30_spill]] }
 0x65e   : > { %s3799_s14 = smov %s2807_s15  ;;  %s3800_s15 = smov %s3796_s29 }
 0x65f   : > { %s3801_s16 = smov %s2815_s17  ;;  %s3802_s17 = smov %s2819_s18 }
 0x660   : > { %s3803_s18 = smov %s3203_s11  ;;  %s3804_s19 = smov %s2827_s20 }
 0x661   : > { %s3805_s20 = smov %s2831_s21  ;;  %s3806_s21 = smov %s3149_s3 }
 0x662   : > { %s3807_s22 = smov %s2843_s24  ;;  %s3808_s23 = smov %s2847_s25 }
 0x663   : > { %s3809_s24 = smov %s3797_s10  ;;  %s3810_s25 = smov %s3798_s6 }
 0x664   :  { %33 = sbr.rel (!%p3641_p3) target bundleno = 27 (0x1b), region = 151 }
 0x66b   :  { %1760 = vsyncpa [#allocation4], 1 }
 0x66c   :  { %1762 = vsyncpa [#allocation4 + $0x1], 1 }
 0x66d   :  { %1763 = vsyncpa [#allocation7], 1 }
 0x66e   :  { %1765 = vsyncpa [#allocation7 + $0x1], 1 }
 0x66f   :  { %1766 = vsyncpa [#allocation10], 1 }
 0x670   :  { %1767 = vsyncpa [#allocation5], 1 }
 0x671   :  { %1769 = vsyncpa [#allocation5 + $0x1], 1 }
 0x672   :  { %1770 = vsyncpa [#allocation14], 1 }
 0x673   :  { %1772 = vsyncpa [#allocation14 + $0x1], 1 }

</bundles_post_ra>
